<compile_context>
chip_gen: v7x
topology: tpu7x:2x2x1
jax: 0.10.0
libtpu: 0.0.40
codegen_flags: <defaults>
</compile_context>

<pallas_src>
import functools
import math

import jax
import jax.numpy as jnp
from jax import lax
from jax.experimental import pallas as pl
from jax.experimental.pallas import tpu as pltpu


def _layernorm(v, scale, shift, eps=1e-5):
    mean = jnp.mean(v, axis=-1, keepdims=True)
    c = v - mean
    var = jnp.mean(c * c, axis=-1, keepdims=True)        # unbiased=False (PyTorch)
    return scale * (c * lax.rsqrt(var + eps)) + shift    # rsqrt -> EUP, not VALU divide


def _gelu_tanh(x):
    c = math.sqrt(2.0 / math.pi)
    return 0.5 * x * (1.0 + jnp.tanh(c * (x + 0.044715 * x * x * x)))


def _round_up(a, b):
    return ((a + b - 1) // b) * b


def _const_spec(shape, *, single_buffer=True):
    """BlockSpec for a grid-invariant (weight/bias) input.

    The index map is constant, so double-buffering buys nothing; request a single
    buffer when the running JAX exposes BlockSpec(pipeline_mode=...).
    """
    index_map = lambda *_: (0,) * len(shape)
    if single_buffer:
        try:
            return pl.BlockSpec(shape, index_map, pipeline_mode=pl.Buffered(1))
        except (TypeError, AttributeError):
            pass
    return pl.BlockSpec(shape, index_map)


def _vmem_limit(est_bytes):
    """Scoped-VMEM request: estimate + headroom, clamped below physical capacity."""
    try:
        cap = pltpu.get_tpu_info().vmem_capacity_bytes
    except Exception:
        cap = 128 * 2 ** 20               # v5e/v6e physical; v7x reports 64 MiB
    ceiling = cap - (16 * 2 ** 20)        # leave compiler scratch / spill headroom
    return int(max(16 * 2 ** 20, min(est_bytes + (4 * 2 ** 20), ceiling)))


# ----------------------------- Pass 1: LN1 + Q/K/V ---------------------------------- #

def ln_qkv_kernel(x_ref, ln1s_ref, ln1b_ref, wq_ref, wk_ref, wv_ref,
                  q_ref, k_ref, v_ref, *, num_heads, sm_scale):
    x = x_ref[0]                                    # (ts, D) f32
    D = x.shape[-1]
    hd = D // num_heads
    cd = wq_ref.dtype

    h = _layernorm(x, ln1s_ref[0], ln1b_ref[0]).astype(cd)

    # Full-width (ts, D) x (D, D) MXU matmuls, f32 accumulation.  sm_scale is folded
    # into Q once here instead of scaling the (H, tq, tk) scores every kv step.
    q = jnp.dot(h, wq_ref[...], preferred_element_type=jnp.float32) * sm_scale
    k = jnp.dot(h, wk_ref[...], preferred_element_type=jnp.float32)
    v = jnp.dot(h, wv_ref[...], preferred_element_type=jnp.float32)

    # Head split to (H, ts, hd).  hd is a multiple of 128 in the demo, so every slice
    # is lane-aligned (plain vld/vst, no relayout / masked partial stores).
    def split(a):
        return jnp.stack([a[:, i * hd:(i + 1) * hd] for i in range(num_heads)], axis=0)

    q_ref[0] = split(q).astype(q_ref.dtype)
    k_ref[0] = split(k).astype(k_ref.dtype)
    v_ref[0] = split(v).astype(v_ref.dtype)


# ----------------- Pass 2: flash attention + out-proj + LN2 + FFN ------------------- #

def attn_ffn_kernel(xres_ref, q_ref, k_ref, v_ref,
                    wo_ref, bo_ref, ln2s_ref, ln2b_ref,
                    w1_ref, b1_ref, w2_ref, b2_ref,
                    o_ref, m_sc, l_sc, acc_sc,
                    *, num_heads, approx_recip):
    qi = pl.program_id(1)
    ki = pl.program_id(2)
    n_kv = pl.num_programs(2)

    tq = q_ref.shape[2]
    tk = k_ref.shape[2]
    cd = q_ref.dtype

    @pl.when(ki == 0)
    def _():
        m_sc[...] = jnp.full(m_sc.shape, -1e30, dtype=m_sc.dtype)
        l_sc[...] = jnp.zeros(l_sc.shape, dtype=l_sc.dtype)
        acc_sc[...] = jnp.zeros(acc_sc.shape, dtype=acc_sc.dtype)

    # Causal skip: a kv tile is fully masked iff its first key position is beyond the
    # last query position of this q tile -- skip all of its MXU / exp / VPU work.
    @pl.when(ki * tk <= qi * tq + (tq - 1))
    def _():
        q_h = q_ref[0]                              # (H, tq, hd), sm_scale pre-folded
        k_h = k_ref[0]                              # (H, tk, hd)
        v_h = v_ref[0]                              # (H, tk, hd)

        # Batched scores for all heads, f32 accumulation on the MXU.
        s = jnp.einsum("hqd,hkd->hqk", q_h, k_h,
                       preferred_element_type=jnp.float32)          # (H, tq, tk)

        # Additive finite causal mask for this (tq, tk) tile (also masks padded keys,
        # which sit at positions >= T > every real query position).
        q_pos = qi * tq + lax.broadcasted_iota(jnp.int32, (tq, tk), 0)
        k_pos = ki * tk + lax.broadcasted_iota(jnp.int32, (tq, tk), 1)
        s = s + jnp.where(k_pos > q_pos,
                          jnp.float32(-1e30), jnp.float32(0.0))[None]

        # Online (flash) softmax update.
        m_prev = m_sc[...]
        m_new = jnp.maximum(m_prev, jnp.max(s, axis=-1, keepdims=True))
        alpha = jnp.exp(m_prev - m_new)
        p = jnp.exp(s - m_new)
        l_sc[...] = alpha * l_sc[...] + jnp.sum(p, axis=-1, keepdims=True)
        acc_sc[...] = alpha * acc_sc[...] + jnp.einsum(
            "hqk,hkd->hqd", p.astype(cd), v_h, preferred_element_type=jnp.float32)
        m_sc[...] = m_new

    # Last kv step: finish attention, out-proj, residual 1, LN2, FFN, residual 2.
    @pl.when(ki == n_kv - 1)
    def _():
        inv_l = pl.reciprocal(l_sc[...], approx=approx_recip)        # EUP vrcp
        ctx_h = acc_sc[...] * inv_l                                  # (H, tq, hd) f32
        # Head merge; slabs are lane-aligned (hd multiple of 128) -> full-width stores.
        ctx = jnp.concatenate([ctx_h[h] for h in range(num_heads)], axis=-1)  # (tq, D)

        attn_out = jnp.dot(ctx.astype(cd), wo_ref[...],
                           preferred_element_type=jnp.float32) + bo_ref[...]
        x1 = xres_ref[0] + attn_out                                  # residual 1

        h2 = _layernorm(x1, ln2s_ref[0], ln2b_ref[0])
        f1 = jnp.dot(h2.astype(cd), w1_ref[...],
                     preferred_element_type=jnp.float32) + b1_ref[...]
        g = _gelu_tanh(f1)
        f2 = jnp.dot(g.astype(cd), w2_ref[...],
                     preferred_element_type=jnp.float32) + b2_ref[...]

        o_ref[0] = (x1 + f2).astype(o_ref.dtype)                     # residual 2


# ------------------------------------ wrapper --------------------------------------- #

def transformer_block(x, params, num_heads, *, seq_tile=128,
                      compute_dtype=jnp.bfloat16, approx_recip=True):
    """TransformerBlock forward (eval mode: dropout = identity)."""
    B, T, D = x.shape
    assert D % num_heads == 0
    hd = D // num_heads            # best perf when hd is a multiple of 128 (lane-aligned)
    H4 = params["w1"].shape[1]
    cd = compute_dtype
    cdsz = jnp.dtype(cd).itemsize
    sm_scale = 1.0 / math.sqrt(hd)

    # Sequence tile (shared by the projection pass and the q / kv tiling).  T is padded
    # to a multiple of it; padded keys are causally masked, padded query rows sliced off.
    tile = max(8, min(_round_up(seq_tile, 8), _round_up(T, 8)))
    Tp = _round_up(T, tile)
    n_t = Tp // tile
    x_p = x if Tp == T else jnp.pad(x, ((0, 0), (0, Tp - T), (0, 0)))

    # Big weight matrices travel in the compute dtype (bf16 halves HBM traffic and
    # resident VMEM on v5e/v6e/v7x alike); LN params & biases stay f32.
    wq = params["wq"].astype(cd)
    wk = params["wk"].astype(cd)
    wv = params["wv"].astype(cd)
    wo = params["wo"].astype(cd)
    w1 = params["w1"].astype(cd)
    w2 = params["w2"].astype(cd)

    # ---- Pass 1: LayerNorm-1 + Q/K/V projection, once per (batch, sequence tile). ----
    qkv_est = (2 * (3 * D * D * cdsz + 2 * D * 4)             # weights (worst case 2x)
               + 2 * (tile * D * 4 + 3 * tile * D * cdsz)     # double-buffered I/O blocks
               + 8 * tile * D * 4)                            # activation slack
    q_hm, k_hm, v_hm = pl.pallas_call(
        functools.partial(ln_qkv_kernel, num_heads=num_heads, sm_scale=sm_scale),
        out_shape=tuple(jax.ShapeDtypeStruct((B, num_heads, Tp, hd), cd)
                        for _ in range(3)),
        grid_spec=pltpu.PrefetchScalarGridSpec(
            num_scalar_prefetch=0,
            grid=(B, n_t),
            in_specs=[
                pl.BlockSpec((1, tile, D), lambda b, s: (b, s, 0)),   # x tile
                _const_spec((1, D)), _const_spec((1, D)),             # ln1 scale/shift
                _const_spec((D, D)), _const_spec((D, D)), _const_spec((D, D)),
            ],
            out_specs=tuple(
                pl.BlockSpec((1, num_heads, tile, hd), lambda b, s: (b, 0, s, 0))
                for _ in range(3)),
        ),
        compiler_params=pltpu.CompilerParams(
            dimension_semantics=("parallel", "parallel"),
            vmem_limit_bytes=_vmem_limit(qkv_est)),
    )(x_p, params["ln1_scale"], params["ln1_shift"], wq, wk, wv)

    # ---- Pass 2: flash attention over kv tiles + out-proj + LN2 + FFN + residuals. ----
    attn_est = (2 * ((D * D + 2 * D * H4) * cdsz + (6 * D + H4) * 4)          # weights
                + 2 * (2 * tile * D * 4 + 3 * num_heads * tile * hd * cdsz)   # I/O blocks
                + num_heads * tile * (hd + 2) * 4                             # scratch
                + (4 * num_heads * tile * tile + 6 * tile * D + 2 * tile * H4) * 4)
    out_p = pl.pallas_call(
        functools.partial(attn_ffn_kernel, num_heads=num_heads,
                          approx_recip=approx_recip),
        out_shape=jax.ShapeDtypeStruct((B, Tp, D), jnp.float32),
        grid_spec=pltpu.PrefetchScalarGridSpec(
            num_scalar_prefetch=0,
            grid=(B, n_t, n_t),
            in_specs=[
                pl.BlockSpec((1, tile, D), lambda b, qi, ki: (b, qi, 0)),       # residual x
                pl.BlockSpec((1, num_heads, tile, hd),
                             lambda b, qi, ki: (b, 0, qi, 0)),                  # Q tile
                pl.BlockSpec((1, num_heads, tile, hd),
                             lambda b, qi, ki: (b, 0, ki, 0)),                  # K tile
                pl.BlockSpec((1, num_heads, tile, hd),
                             lambda b, qi, ki: (b, 0, ki, 0)),                  # V tile
                _const_spec((D, D)), _const_spec((1, D)),                       # Wo, bo
                _const_spec((1, D)), _const_spec((1, D)),                       # ln2
                _const_spec((D, H4)), _const_spec((1, H4)),                     # W1, b1
                _const_spec((H4, D)), _const_spec((1, D)),                      # W2, b2
            ],
            out_specs=pl.BlockSpec((1, tile, D), lambda b, qi, ki: (b, qi, 0)),
            scratch_shapes=[
                pltpu.VMEM((num_heads, tile, 1), jnp.float32),    # running max
                pltpu.VMEM((num_heads, tile, 1), jnp.float32),    # running denom
                pltpu.VMEM((num_heads, tile, hd), jnp.float32),   # running ctx acc
            ],
        ),
        compiler_params=pltpu.CompilerParams(
            # b / q-tile shard across TensorCores (v7x megacore); kv is the sequential
            # online-softmax axis.
            dimension_semantics=("parallel", "parallel", "arbitrary"),
            vmem_limit_bytes=_vmem_limit(attn_est)),
    )(x_p, q_hm, k_hm, v_hm,
      wo, params["bo"], params["ln2_scale"], params["ln2_shift"],
      w1, params["b1"], w2, params["b2"])

    return out_p if Tp == T else out_p[:, :T, :]


# ---------------------------------- reference --------------------------------------- #

def reference(x, params, num_heads):
    B, T, D = x.shape
    hd = D // num_heads

    def ln(v, s, b):
        mean = jnp.mean(v, -1, keepdims=True)
        var = jnp.mean((v - mean) ** 2, -1, keepdims=True)
        return s * (v - mean) / jnp.sqrt(var + 1e-5) + b

    h = ln(x, params["ln1_scale"], params["ln1_shift"])
    q = h @ params["wq"]
    k = h @ params["wk"]
    v = h @ params["wv"]
    q = q.reshape(B, T, num_heads, hd).transpose(0, 2, 1, 3)
    k = k.reshape(B, T, num_heads, hd).transpose(0, 2, 1, 3)
    v = v.reshape(B, T, num_heads, hd).transpose(0, 2, 1, 3)
    scores = jnp.einsum("bhqd,bhkd->bhqk", q, k) / math.sqrt(hd)
    mask = jnp.triu(jnp.ones((T, T), bool), 1)
    scores = jnp.where(mask, -jnp.inf, scores)
    w = jax.nn.softmax(scores, axis=-1)
    ctx = jnp.einsum("bhqk,bhkd->bhqd", w, v).transpose(0, 2, 1, 3).reshape(B, T, D)
    attn_out = ctx @ params["wo"] + params["bo"][0]
    x1 = x + attn_out
    h2 = ln(x1, params["ln2_scale"], params["ln2_shift"])
    c = math.sqrt(2.0 / math.pi)
    f1 = h2 @ params["w1"] + params["b1"][0]
    g = 0.5 * f1 * (1 + jnp.tanh(c * (f1 + 0.044715 * f1 ** 3)))
    f2 = g @ params["w2"] + params["b2"][0]
    return x1 + f2


if __name__ == "__main__":
    # Small config consistent with the module, but lane-friendly: emb_dim multiple of
    # 128 and head_dim = 128 (feedback: lane-aligned heads / bigger MXU contraction).
    # T=12 is deliberately NOT a multiple of the tile to exercise the padding path.
    B, T, D, H = 2, 12, 256, 2
    H4 = 4 * D

    key = jax.random.PRNGKey(0)
    ks = jax.random.split(key, 10)
    init = lambda k, shp: (0.02 * jax.random.normal(k, shp)).astype(jnp.float32)

    params = {
        "ln1_scale": jnp.ones((1, D), jnp.float32),
        "ln1_shift": jnp.zeros((1, D), jnp.float32),
        "wq": init(ks[0], (D, D)),
        "wk": init(ks[1], (D, D)),
        "wv": init(ks[2], (D, D)),
        "wo": init(ks[3], (D, D)),
        "bo": init(ks[4], (1, D)),
        "ln2_scale": jnp.ones((1, D), jnp.float32),
        "ln2_shift": jnp.zeros((1, D), jnp.float32),
        "w1": init(ks[5], (D, H4)),
        "b1": init(ks[6], (1, H4)),
        "w2": init(ks[7], (H4, D)),
        "b2": init(ks[8], (1, D)),
    }

    x = jax.random.uniform(ks[9], (B, T, D), jnp.float32)
    ref = reference(x, params, num_heads=H)

    # Exact-semantics path: f32 operands, exact reciprocal -> tight tolerance.
    out_f32 = jax.block_until_ready(
        transformer_block(x, params, num_heads=H, seq_tile=8,
                          compute_dtype=jnp.float32, approx_recip=False))
    assert out_f32.shape == (B, T, D)
    assert jnp.allclose(out_f32, ref, atol=1e-4, rtol=1e-4), \
        float(jnp.max(jnp.abs(out_f32 - ref)))

    # Production path (recommended on v5e/v6e/v7x): bf16 MXU operands with f32
    # accumulation + EUP approximate reciprocal for the softmax denominator.
    out_bf16 = jax.block_until_ready(
        transformer_block(x, params, num_heads=H, seq_tile=8))
    assert jnp.allclose(out_bf16, ref, atol=3e-2, rtol=3e-2), \
        float(jnp.max(jnp.abs(out_bf16 - ref)))

    print("KERNEL_OK")
</pallas_src>

<mosaic_0001>
module attributes {stable_mosaic.version = 11 : i64} {
  func.func @ln_qkv_kernel(%arg0: i32, %arg1: i32, %arg2: memref<1x8x256xf32, #tpu.memory_space<vmem>>, %arg3: memref<1x256xf32, #tpu.memory_space<vmem>>, %arg4: memref<1x256xf32, #tpu.memory_space<vmem>>, %arg5: memref<256x256xf32, #tpu.memory_space<vmem>>, %arg6: memref<256x256xf32, #tpu.memory_space<vmem>>, %arg7: memref<256x256xf32, #tpu.memory_space<vmem>>, %arg8: memref<1x2x8x128xf32, #tpu.memory_space<vmem>>, %arg9: memref<1x2x8x128xf32, #tpu.memory_space<vmem>>, %arg10: memref<1x2x8x128xf32, #tpu.memory_space<vmem>>) attributes {dimension_semantics = [#tpu.dimension_semantics<parallel>, #tpu.dimension_semantics<parallel>], iteration_bounds = array<i64: 2, 2>, scalar_prefetch = 0 : i64, scratch_operands = 0 : i64, tpu.core_type = #tpu.core_type<tc>, window_params = [{transform_indices = @transform_0, window_bounds = array<i64: 1, 8, 256>}, {pipeline_mode = #tpu.pipeline_mode<synchronous>, transform_indices = @transform_1, window_bounds = array<i64: 1, 256>}, {pipeline_mode = #tpu.pipeline_mode<synchronous>, transform_indices = @transform_2, window_bounds = array<i64: 1, 256>}, {pipeline_mode = #tpu.pipeline_mode<synchronous>, transform_indices = @transform_3, window_bounds = array<i64: 256, 256>}, {pipeline_mode = #tpu.pipeline_mode<synchronous>, transform_indices = @transform_4, window_bounds = array<i64: 256, 256>}, {pipeline_mode = #tpu.pipeline_mode<synchronous>, transform_indices = @transform_5, window_bounds = array<i64: 256, 256>}, {transform_indices = @transform_6, window_bounds = array<i64: 1, 2, 8, 128>}, {transform_indices = @transform_7, window_bounds = array<i64: 1, 2, 8, 128>}, {transform_indices = @transform_8, window_bounds = array<i64: 1, 2, 8, 128>}]} {
    %c0 = arith.constant 0 : index
    %c0_0 = arith.constant 0 : index
    %c0_1 = arith.constant 0 : index
    %0 = vector.load %arg2[%c0, %c0_0, %c0_1] : memref<1x8x256xf32, #tpu.memory_space<vmem>>, vector<1x8x256xf32>
    %1 = vector.shape_cast %0 : vector<1x8x256xf32> to vector<8x256xf32>
    %c0_2 = arith.constant 0 : index
    %c0_3 = arith.constant 0 : index
    %2 = vector.load %arg3[%c0_2, %c0_3] : memref<1x256xf32, #tpu.memory_space<vmem>>, vector<1x256xf32>
    %3 = vector.shape_cast %2 : vector<1x256xf32> to vector<256xf32>
    %c0_4 = arith.constant 0 : index
    %c0_5 = arith.constant 0 : index
    %4 = vector.load %arg4[%c0_4, %c0_5] : memref<1x256xf32, #tpu.memory_space<vmem>>, vector<1x256xf32>
    %5 = vector.shape_cast %4 : vector<1x256xf32> to vector<256xf32>
    %cst = arith.constant dense<0.000000e+00> : vector<8xf32>
    %6 = vector.multi_reduction <add>, %1, %cst [1] : vector<8x256xf32> to vector<8xf32>
    %7 = vector.shape_cast %6 : vector<8xf32> to vector<8x1xf32>
    %cst_6 = arith.constant 2.560000e+02 : f32
    %8 = vector.broadcast %cst_6 : f32 to vector<8x1xf32>
    %9 = arith.divf %7, %8 : vector<8x1xf32>
    %10 = vector.broadcast %9 : vector<8x1xf32> to vector<8x256xf32>
    %11 = arith.subf %1, %10 : vector<8x256xf32>
    %12 = arith.mulf %11, %11 : vector<8x256xf32>
    %cst_7 = arith.constant dense<0.000000e+00> : vector<8xf32>
    %13 = vector.multi_reduction <add>, %12, %cst_7 [1] : vector<8x256xf32> to vector<8xf32>
    %14 = vector.shape_cast %13 : vector<8xf32> to vector<8x1xf32>
    %cst_8 = arith.constant 2.560000e+02 : f32
    %15 = vector.broadcast %cst_8 : f32 to vector<8x1xf32>
    %16 = arith.divf %14, %15 : vector<8x1xf32>
    %cst_9 = arith.constant 9.99999974E-6 : f32
    %17 = vector.broadcast %cst_9 : f32 to vector<8x1xf32>
    %18 = arith.addf %16, %17 : vector<8x1xf32>
    %19 = math.rsqrt %18 : vector<8x1xf32>
    %20 = vector.broadcast %19 : vector<8x1xf32> to vector<8x256xf32>
    %21 = arith.mulf %11, %20 : vector<8x256xf32>
    %22 = vector.shape_cast %3 : vector<256xf32> to vector<1x256xf32>
    %23 = vector.broadcast %22 : vector<1x256xf32> to vector<8x256xf32>
    %24 = arith.mulf %23, %21 : vector<8x256xf32>
    %25 = vector.shape_cast %5 : vector<256xf32> to vector<1x256xf32>
    %26 = vector.broadcast %25 : vector<1x256xf32> to vector<8x256xf32>
    %27 = arith.addf %24, %26 : vector<8x256xf32>
    %c0_10 = arith.constant 0 : index
    %c0_11 = arith.constant 0 : index
    %28 = vector.load %arg5[%c0_10, %c0_11] : memref<256x256xf32, #tpu.memory_space<vmem>>, vector<256x256xf32>
    %cst_12 = arith.constant dense<0.000000e+00> : vector<8x256xf32>
    %29 = tpu.matmul %27, %28, %cst_12 {dimension_numbers = #tpu.dot_dimension_numbers<[1], [0], [0], [1], [0, 0, 1, 1], [], []>} : vector<8x256xf32>, vector<256x256xf32>, vector<8x256xf32> -> vector<8x256xf32>
    %cst_13 = arith.constant 0.0883883461 : f32
    %30 = vector.broadcast %cst_13 : f32 to vector<8x256xf32>
    %31 = arith.mulf %29, %30 : vector<8x256xf32>
    %c0_14 = arith.constant 0 : index
    %c0_15 = arith.constant 0 : index
    %32 = vector.load %arg6[%c0_14, %c0_15] : memref<256x256xf32, #tpu.memory_space<vmem>>, vector<256x256xf32>
    %cst_16 = arith.constant dense<0.000000e+00> : vector<8x256xf32>
    %33 = tpu.matmul %27, %32, %cst_16 {dimension_numbers = #tpu.dot_dimension_numbers<[1], [0], [0], [1], [0, 0, 1, 1], [], []>} : vector<8x256xf32>, vector<256x256xf32>, vector<8x256xf32> -> vector<8x256xf32>
    %c0_17 = arith.constant 0 : index
    %c0_18 = arith.constant 0 : index
    %34 = vector.load %arg7[%c0_17, %c0_18] : memref<256x256xf32, #tpu.memory_space<vmem>>, vector<256x256xf32>
    %cst_19 = arith.constant dense<0.000000e+00> : vector<8x256xf32>
    %35 = tpu.matmul %27, %34, %cst_19 {dimension_numbers = #tpu.dot_dimension_numbers<[1], [0], [0], [1], [0, 0, 1, 1], [], []>} : vector<8x256xf32>, vector<256x256xf32>, vector<8x256xf32> -> vector<8x256xf32>
    %36 = vector.extract_strided_slice %31 {offsets = [0, 0], sizes = [8, 128], strides = [1, 1]} : vector<8x256xf32> to vector<8x128xf32>
    %37 = vector.extract_strided_slice %31 {offsets = [0, 128], sizes = [8, 128], strides = [1, 1]} : vector<8x256xf32> to vector<8x128xf32>
    %38 = vector.shape_cast %36 : vector<8x128xf32> to vector<1x8x128xf32>
    %39 = vector.shape_cast %37 : vector<8x128xf32> to vector<1x8x128xf32>
    %40 = tpu.concatenate %38, %39 in 0 : vector<1x8x128xf32>, vector<1x8x128xf32> -> vector<2x8x128xf32>
    %c0_20 = arith.constant 0 : index
    %c0_21 = arith.constant 0 : index
    %c0_22 = arith.constant 0 : index
    %c0_23 = arith.constant 0 : index
    %41 = vector.load %arg8[%c0_20, %c0_21, %c0_22, %c0_23] : memref<1x2x8x128xf32, #tpu.memory_space<vmem>>, vector<1x2x8x128xf32>
    %42 = vector.shape_cast %41 : vector<1x2x8x128xf32> to vector<2x8x128xf32>
    %43 = vector.shape_cast %40 : vector<2x8x128xf32> to vector<1x2x8x128xf32>
    tpu.vector_store %arg8[%c0_20, %c0_21, %c0_22, %c0_23], %43 {strides = array<i32>} : memref<1x2x8x128xf32, #tpu.memory_space<vmem>>, vector<1x2x8x128xf32>,
    %44 = vector.extract_strided_slice %33 {offsets = [0, 0], sizes = [8, 128], strides = [1, 1]} : vector<8x256xf32> to vector<8x128xf32>
    %45 = vector.extract_strided_slice %33 {offsets = [0, 128], sizes = [8, 128], strides = [1, 1]} : vector<8x256xf32> to vector<8x128xf32>
    %46 = vector.shape_cast %44 : vector<8x128xf32> to vector<1x8x128xf32>
    %47 = vector.shape_cast %45 : vector<8x128xf32> to vector<1x8x128xf32>
    %48 = tpu.concatenate %46, %47 in 0 : vector<1x8x128xf32>, vector<1x8x128xf32> -> vector<2x8x128xf32>
    %c0_24 = arith.constant 0 : index
    %c0_25 = arith.constant 0 : index
    %c0_26 = arith.constant 0 : index
    %c0_27 = arith.constant 0 : index
    %49 = vector.load %arg9[%c0_24, %c0_25, %c0_26, %c0_27] : memref<1x2x8x128xf32, #tpu.memory_space<vmem>>, vector<1x2x8x128xf32>
    %50 = vector.shape_cast %49 : vector<1x2x8x128xf32> to vector<2x8x128xf32>
    %51 = vector.shape_cast %48 : vector<2x8x128xf32> to vector<1x2x8x128xf32>
    tpu.vector_store %arg9[%c0_24, %c0_25, %c0_26, %c0_27], %51 {strides = array<i32>} : memref<1x2x8x128xf32, #tpu.memory_space<vmem>>, vector<1x2x8x128xf32>,
    %52 = vector.extract_strided_slice %35 {offsets = [0, 0], sizes = [8, 128], strides = [1, 1]} : vector<8x256xf32> to vector<8x128xf32>
    %53 = vector.extract_strided_slice %35 {offsets = [0, 128], sizes = [8, 128], strides = [1, 1]} : vector<8x256xf32> to vector<8x128xf32>
    %54 = vector.shape_cast %52 : vector<8x128xf32> to vector<1x8x128xf32>
    %55 = vector.shape_cast %53 : vector<8x128xf32> to vector<1x8x128xf32>
    %56 = tpu.concatenate %54, %55 in 0 : vector<1x8x128xf32>, vector<1x8x128xf32> -> vector<2x8x128xf32>
    %c0_28 = arith.constant 0 : index
    %c0_29 = arith.constant 0 : index
    %c0_30 = arith.constant 0 : index
    %c0_31 = arith.constant 0 : index
    %57 = vector.load %arg10[%c0_28, %c0_29, %c0_30, %c0_31] : memref<1x2x8x128xf32, #tpu.memory_space<vmem>>, vector<1x2x8x128xf32>
    %58 = vector.shape_cast %57 : vector<1x2x8x128xf32> to vector<2x8x128xf32>
    %59 = vector.shape_cast %56 : vector<2x8x128xf32> to vector<1x2x8x128xf32>
    tpu.vector_store %arg10[%c0_28, %c0_29, %c0_30, %c0_31], %59 {strides = array<i32>} : memref<1x2x8x128xf32, #tpu.memory_space<vmem>>, vector<1x2x8x128xf32>,
    return
  }
  func.func @transform_0(%arg0: i32, %arg1: i32) -> (i32, i32, i32) {
    %c0_i32 = arith.constant 0 : i32
    %c0_i32_0 = arith.constant 0 : i32
    return %arg0, %arg1, %c0_i32 : i32, i32, i32
  }
  func.func @transform_1(%arg0: i32, %arg1: i32) -> (i32, i32) {
    %c0_i32 = arith.constant 0 : i32
    %c0_i32_0 = arith.constant 0 : i32
    %c0_i32_1 = arith.constant 0 : i32
    return %c0_i32, %c0_i32_0 : i32, i32
  }
  func.func @transform_2(%arg0: i32, %arg1: i32) -> (i32, i32) {
    %c0_i32 = arith.constant 0 : i32
    %c0_i32_0 = arith.constant 0 : i32
    %c0_i32_1 = arith.constant 0 : i32
    return %c0_i32, %c0_i32_0 : i32, i32
  }
  func.func @transform_3(%arg0: i32, %arg1: i32) -> (i32, i32) {
    %c0_i32 = arith.constant 0 : i32
    %c0_i32_0 = arith.constant 0 : i32
    %c0_i32_1 = arith.constant 0 : i32
    return %c0_i32, %c0_i32_0 : i32, i32
  }
  func.func @transform_4(%arg0: i32, %arg1: i32) -> (i32, i32) {
    %c0_i32 = arith.constant 0 : i32
    %c0_i32_0 = arith.constant 0 : i32
    %c0_i32_1 = arith.constant 0 : i32
    return %c0_i32, %c0_i32_0 : i32, i32
  }
  func.func @transform_5(%arg0: i32, %arg1: i32) -> (i32, i32) {
    %c0_i32 = arith.constant 0 : i32
    %c0_i32_0 = arith.constant 0 : i32
    %c0_i32_1 = arith.constant 0 : i32
    return %c0_i32, %c0_i32_0 : i32, i32
  }
  func.func @transform_6(%arg0: i32, %arg1: i32) -> (i32, i32, i32, i32) {
    %c0_i32 = arith.constant 0 : i32
    %c0_i32_0 = arith.constant 0 : i32
    %c0_i32_1 = arith.constant 0 : i32
    return %arg0, %c0_i32, %arg1, %c0_i32_0 : i32, i32, i32, i32
  }
  func.func @transform_7(%arg0: i32, %arg1: i32) -> (i32, i32, i32, i32) {
    %c0_i32 = arith.constant 0 : i32
    %c0_i32_0 = arith.constant 0 : i32
    %c0_i32_1 = arith.constant 0 : i32
    return %arg0, %c0_i32, %arg1, %c0_i32_0 : i32, i32, i32, i32
  }
  func.func @transform_8(%arg0: i32, %arg1: i32) -> (i32, i32, i32, i32) {
    %c0_i32 = arith.constant 0 : i32
    %c0_i32_0 = arith.constant 0 : i32
    %c0_i32_1 = arith.constant 0 : i32
    return %arg0, %c0_i32, %arg1, %c0_i32_0 : i32, i32, i32, i32
  }
}

</mosaic_0001>

<bundles_post_ra>
// kernel: tpu_custom_call.1
= control target key start
LH: loop header
LB: loop body
LE: loop exit
PB: predicated region body
PF: predicated region fallthrough
CT: control target
= control target key end

     0   :  { %s2224_s0 = inlined_call_operand.hbm [shape: f32[2,16,256], index: 0, kind: input, shape index: {}]   ;;  %s2225_s1 = inlined_call_operand.vmem [shape: f32[1,256], index: 1, kind: input, shape index: {}]   ;;  %s2226_s2 = inlined_call_operand.vmem [shape: f32[1,256], index: 2, kind: input, shape index: {}]   ;;  %s2227_s3 = inlined_call_operand.hbm [shape: f32[256,256], index: 3, kind: input, shape index: {}]   ;;  %s2228_s4 = inlined_call_operand.hbm [shape: f32[256,256], index: 4, kind: input, shape index: {}]   ;;  %s2229_s5 = inlined_call_operand.hbm [shape: f32[256,256], index: 5, kind: input, shape index: {}]   ;;  %s2230_s6 = inlined_call_operand.hbm [shape: f32[2,2,16,128], index: 6, kind: output, shape index: {0}]   ;;  %s2231_s7 = inlined_call_operand.hbm [shape: f32[2,2,16,128], index: 7, kind: output, shape index: {1}]   ;;  %s2232_s8 = inlined_call_operand.hbm [shape: f32[2,2,16,128], index: 8, kind: output, shape index: {2}]  }
   0x1   :  { %2243 = sst [smem:[#allocation23_spill]] %s2227_s3 }
   0x2   :  { %2244 = sst [smem:[#allocation24_spill]] %s2228_s4 }
   0x3   :  { %2245 = sst [smem:[#allocation25_spill]] %s2229_s5 }
   0x4   :  { %2246 = sst [smem:[#allocation26_spill]] %s2230_s6 }
   0x5   :  { %2247 = sst [smem:[#allocation27_spill]] %s2231_s7 }
   0x6   :  { %2248 = sst [smem:[#allocation28_spill]] %s2232_s8 }
   0x7   :  { %14 = vsyncpa [#allocation3], 0 }
   0x8   :  { %16 = vsyncpa [#allocation3 + $0x1], 0 }
   0x9   :  { %17 = vsyncpa [#allocation6], 0 }
   0xa   :  { %18 = vsyncpa [#allocation9], 0 }
   0xb   :  { %19 = vsyncpa [#allocation4], 0 }
   0xc   :  { %21 = vsyncpa [#allocation4 + $0x1], 0 }
   0xd   :  { %22 = vsyncpa [#allocation12], 0 }
   0xe   :  { %24 = vsyncpa [#allocation12 + $0x1], 0  ;;  %s1795_s27 = smov 0   ;;  %s1797_s28 = smov 0  }
   0xf   :  { %s1799_s29 = smov 0   ;;  %s1801_s30 = smov 0  }
  0x10   :  { %s1803_s9 = smov 0   ;;  %s1805_s10 = smov 0  }
  0x11   :  { %s1807_s11 = smov 0   ;;  %s1809_s12 = smov 0  }
  0x12 LB: > { %2249 = sst [smem:[#allocation19_spill]] %s1708_s27  ;;  %s1836_s13 = sadd.s32 4294967295, %s1736_s12   ;;  %s1736_s12 = sphi %s1809_s12, %s30_s12   ;;  %s1732_s11 = sphi %s1807_s11, %s2287_s11   ;;  %s1728_s10 = sphi %s1805_s10, %s2286_s10   ;;  %s1724_s9 = sphi %s1803_s9, %s2285_s9   ;;  %s1720_s30 = sphi %s1801_s30, %s2284_s30   ;;  %s1716_s29 = sphi %s1799_s29, %s2283_s29   ;;  %s1712_s28 = sphi %s1797_s28, %s2282_s28   ;;  %s1708_s27 = sphi %s1795_s27, %s2281_s27  }
  0x13   : > { %2250 = sst [smem:[#allocation20_spill]] %s1720_s30  ;;  %s2233_s14 = sadd.s32 4294967294, %s1736_s12  }
  0x14   : > { %p64_p0 = scmp.ne.s32.totalorder %s1712_s28, %s1708_s27  ;;  %p2236_p1 = scmp.eq.s32.totalorder %s1836_s13, 0 }
  0x15   : > { %p201_p3 = scmp.eq.s32.totalorder %s2233_s14, 3  ;;  %p1110_p5 = scmp.ge.s32.totalorder %s1736_s12, 1 }
  0x16   : > { %p1847_p4 = por %p2236_p1, %p64_p0  ;;  %p264_p7 = scmp.lt.s32.totalorder %s1736_s12, 5 }
  0x17   : > { %p1852_p6 = por %p201_p3, %p64_p0  ;;  %s1738_s18 = smov [#allocation5]  }
  0x18   : > { %s2251_s15 = scalar_select %p1847_p4, 1, 0 }
  0x19   : > { %s2252_s16 = scalar_select %p1852_p6, 1, 0 }
  0x1a   : > { %p1857_p8 = pnand %p1110_p5, %p264_p7  ;;  %s282_s19 = sshll.u32 %s1738_s18, 4  ;;  %s1861_s19 = int_to_ptr.vmem [resolvable:$true] %s282_s19 }
  0x1b   : > { %2253 = sst [smem:[#allocation21_spill]] %s2252_s16  ;;  %s1739_s21 = smov [#allocation7]  }
  0x1c   : > { %s2254_s17 = scalar_select %p1857_p8, 1, 0 }
  0x1d   : > { %p1350_p9 = pneg %p1857_p8  ;;  %s295_s22 = sshll.u32 %s1739_s21, 4  ;;  %s1871_s22 = int_to_ptr.vmem [resolvable:$true] %s295_s22 }
  0x1e   : > { %s1740_s23 = smov [#allocation8]   ;;  %s2256_s3 = sld [smem:[#allocation23_spill]] }
  0x1f   : > { %p1867_p10 = pnand %p1350_p9, %p2236_p1  ;;  %s1873_s24 = sshll.u32 %s1740_s23, 4  ;;  %s309_s24 = int_to_ptr.vmem [resolvable:$true] %s1873_s24 }
  0x21   : > { %p1883_p12 = pneg %p1867_p10 }
  0x24   : > { %s1456_s18 = scalar_lea.hbm %s2256_s3, 8192 }
  0x25   : > { %p1457_p11 = scmp.ne.s32.totalorder %s2256_s3, %s1456_s18  ;;  %p1463_p3 = scmp.lt.u32.totalorder %s1456_s18, %s2256_s3 }
  0x27   : > { %p1459_p13 = pnand %p1883_p12, %p1457_p11 }
  0x29   : > { %p1460_p0 = pneg %p1459_p13 }
  0x2b   : > { %p1465_p5 = pnand %p1463_p3, %p1460_p0 }
  0x2d   : > { %1468 = shalt.err (!%p1465_p5)
}
  0x2e   : > { %s1469_s14 = scalar_lea.vmem %s1861_s19, 8192  ;;  %p1477_p2 = scmp.lt.s32.totalorder %s1861_s19, %s1861_s19 }
  0x2f   : > { %p1470_p7 = scmp.ne.s32.totalorder %s1861_s19, %s1469_s14  ;;  %p1478_p6 = scmp.lt.s32.totalorder %s1469_s14, %s1469_s14 }
  0x31   : > { %p1472_p9 = pnand %p1470_p7, %p1883_p12  ;;  %p1479_p11 = por %p1478_p6, %p1477_p2 }
  0x33   : > { %p1473_p1 = pneg %p1472_p9 }
  0x35   : > { %p1480_p13 = pnand %p1479_p11, %p1473_p1 }
  0x37   : > { %1483 = shalt.err (!%p1480_p13)
}
  0x38   : > { %s1741_s16 = smov 256   ;;  %s1742_s25 = smov 16  }
  0x39   : > { %1353 = dma.hbm_to_vmem [thread:$0]  (!%p1867_p10), %s2256_s3, 8192, %s1861_s19, [#allocation6], %s1741_s16, %s1741_s16, %s1742_s25  }
  0x3a   : > { %s2258_s4 = sld [smem:[#allocation24_spill]] }
  0x40   : > { %s1484_s14 = scalar_lea.hbm %s2258_s4, 8192 }
  0x41   : > { %p1485_p1 = scmp.ne.s32.totalorder %s2258_s4, %s1484_s14  ;;  %p1491_p0 = scmp.lt.u32.totalorder %s1484_s14, %s2258_s4 }
  0x43   : > { %p1487_p2 = pnand %p1485_p1, %p1883_p12 }
  0x45   : > { %p1488_p6 = pneg %p1487_p2 }
  0x47   : > { %p1493_p3 = pnand %p1491_p0, %p1488_p6 }
  0x49   : > { %1496 = shalt.err (!%p1493_p3)
}
  0x4a   : > { %s1497_s19 = scalar_lea.vmem %s1871_s22, 8192  ;;  %p1505_p11 = scmp.lt.s32.totalorder %s1871_s22, %s1871_s22 }
  0x4b   : > { %p1498_p5 = scmp.ne.s32.totalorder %s1871_s22, %s1497_s19  ;;  %p1506_p13 = scmp.lt.s32.totalorder %s1497_s19, %s1497_s19 }
  0x4d   : > { %p1500_p7 = pnand %p1498_p5, %p1883_p12  ;;  %p1507_p1 = por %p1506_p13, %p1505_p11 }
  0x4f   : > { %p1501_p9 = pneg %p1500_p7 }
  0x51   : > { %p1508_p2 = pnand %p1507_p1, %p1501_p9 }
  0x53   : > { %1511 = shalt.err (!%p1508_p2)
}
  0x54   : > { %1356 = dma.hbm_to_vmem [thread:$0]  (!%p1867_p10), %s2258_s4, 8192, %s1871_s22, [#allocation6], %s1741_s16, %s1741_s16, %s1742_s25  }
  0x55   : > { %s2259_s5 = sld [smem:[#allocation25_spill]] }
  0x5b   : > { %s1512_s26 = scalar_lea.hbm %s2259_s5, 8192 }
  0x5c   : > { %p1513_p6 = scmp.ne.s32.totalorder %s2259_s5, %s1512_s26  ;;  %p1519_p5 = scmp.lt.u32.totalorder %s1512_s26, %s2259_s5 }
  0x5e   : > { %p1515_p0 = pnand %p1513_p6, %p1883_p12 }
  0x60   : > { %p1516_p3 = pneg %p1515_p0 }
  0x62   : > { %p1521_p7 = pnand %p1519_p5, %p1516_p3 }
  0x64   : > { %1524 = shalt.err (!%p1521_p7)
}
  0x65   : > { %s1525_s19 = scalar_lea.vmem %s309_s24, 8192  ;;  %p1533_p1 = scmp.lt.s32.totalorder %s309_s24, %s309_s24 }
  0x66   : > { %p1526_p9 = scmp.ne.s32.totalorder %s309_s24, %s1525_s19  ;;  %p1534_p2 = scmp.lt.s32.totalorder %s1525_s19, %s1525_s19 }
  0x68   : > { %p1528_p11 = pnand %p1526_p9, %p1883_p12  ;;  %p1535_p4 = por %p1534_p2, %p1533_p1 }
  0x6a   : > { %p1529_p13 = pneg %p1528_p11 }
  0x6c   : > { %p1536_p8 = pnand %p1535_p4, %p1529_p13 }
  0x6e   : > { %1539 = shalt.err (!%p1536_p8)
}
  0x6f   : > { %1359 = dma.hbm_to_vmem [thread:$0]  (!%p1867_p10), %s2259_s5, 8192, %s309_s24, [#allocation9], %s1741_s16, %s1741_s16, %s1742_s25  }
  0x70   : > { %s39_s27 = sadd.s32 1, %s1728_s10  ;;  %s42_s20 = sadd.s32 1, %s1732_s11 }
  0x71   : > { %p40_p4 = scmp.ge.s32.totalorder %s39_s27, 2  ;;  %s51_s7 = sadd.s32 1, %s1716_s29 }
  0x72   : > { %p58_p8 = scmp.ne.s32.totalorder %s1716_s29, %s1712_s28  ;;  %p59_p12 = scmp.eq.s32.totalorder %s1736_s12, 0 }
  0x73   : > { %s2289_s27 = smov (%p40_p4, %s39_s27), 0  ;;  %s2291_s20 = smov (!%p40_p4, %s42_s20), %s1732_s11 }
  0x74   : > { %s47_s8 = ssub.s32 %s1728_s10, %s2289_s27  ;;  %p44_p6 = scmp.ge.s32.totalorder %s2291_s20, 2 }
  0x75   : > { %p2260_p0 = scmp.eq.s32.totalorder %s1836_s13, 3  ;;  %p1972_p10 = por %p59_p12, %p58_p8 }
  0x76   : > { %p1377_p5 = scmp.lt.s32.totalorder %s1736_s12, 4  ;;  %s2293_s20 = smov (%p44_p6, %s2291_s20), 0 }
  0x77   : > { %p1968_p3 = por %p2260_p0, %p58_p8  ;;  %2263 = sst [smem:[#allocation22_spill]] %s2293_s20 }
  0x78   : > { %s322_s16 = sand.u32 1, %s1716_s29   ;;  %s1116_s25 = sshll.u32 %s1728_s10, 1 }
  0x79   : > { %s46_s26 = ssub.s32 %s1732_s11, %s2293_s20  ;;  %s1115_s21 = sshll.u32 %s322_s16, 4 }
  0x7a   : > { %s48_s18 = sor.u32 %s47_s8, %s46_s26  ;;  %s1117_s23 = sshll.u32 %s1732_s11, 2 }
  0x7b   : > { %p49_p7 = scmp.eq.s32.totalorder %s48_s18, 0  ;;  %s326_s14 = scalar_lea.vmem [#allocation2], %s1115_s21 }
  0x7c   : > { %s336_s19 = sshll.u32 %s326_s14, 4  ;;  %s332_s6 = sadd.s32 %s1117_s23, %s1116_s25  ;;  %s1987_s19 = int_to_ptr.vmem [resolvable:$true] %s336_s19 }
  0x7d   : > { %s1985_s22 = scalar_select %p49_p7, %s1716_s29, %s51_s7  }
  0x7e   : > { %s1118_s3 = sshll.u32 %s332_s6, 7  ;;  %p1993_p9 = pnand %p1377_p5, %p1972_p10 }
  0x7f   : > { %s2000_s8 = scalar_lea.hbm %s2224_s0, %s1118_s3  ;;  %s323_s7 = scalar_lea.sflag [#allocation3], %s322_s16 }
  0x80   : > { %s1540_s25 = scalar_lea.hbm %s2000_s8, 256  ;;  %p1542_p13 = pneg %p1993_p9 }
  0x81   : > { %p1541_p11 = scmp.ne.s32.totalorder %s2000_s8, %s1540_s25  ;;  %s1545_s5 = scalar_lea.hbm %s2224_s0, 1024 }
  0x82   : > { %p1546_p4 = scmp.lt.u32.totalorder %s2000_s8, %s2224_s0  ;;  %p1547_p8 = scmp.lt.u32.totalorder %s1545_s5, %s1540_s25 }
  0x83   : > { %p1543_p1 = pnand %p1542_p13, %p1541_p11  ;;  %p1549_p6 = scmp.lt.u32.totalorder %s1540_s25, %s2000_s8 }
  0x84   : > { %p1548_p12 = por %p1547_p8, %p1546_p4 }
  0x85   : > { %p1544_p2 = pneg %p1543_p1 }
  0x86   : > { %p1550_p0 = por %p1549_p6, %p1548_p12 }
  0x88   : > { %p1551_p10 = pnand %p1550_p0, %p1544_p2 }
  0x8a   : > { %1554 = shalt.err (!%p1551_p10)
}
  0x8b   : > { %s1555_s16 = scalar_lea.vmem %s1987_s19, 256  ;;  %s1743_s18 = smov [#allocation2]  }
  0x8c   : > { %p1556_p5 = scmp.ne.s32.totalorder %s1987_s19, %s1555_s16  ;;  %s1560_s21 = sshll.u32 %s1743_s18, 4  ;;  %s1561_s21 = int_to_ptr.vmem [resolvable:$false] %s1560_s21 }
  0x8d   : > { %s1562_s23 = scalar_lea.vmem %s1561_s21, 512  ;;  %p1563_p1 = scmp.lt.s32.totalorder %s1987_s19, %s1561_s21 }
  0x8e   : > { %p1558_p7 = pnand %p1556_p5, %p1542_p13  ;;  %p1564_p4 = scmp.lt.s32.totalorder %s1562_s23, %s1555_s16 }
  0x90   : > { %p1559_p11 = pneg %p1558_p7  ;;  %p1565_p8 = por %p1564_p4, %p1563_p1 }
  0x92   : > { %p1566_p12 = pnand %p1565_p8, %p1559_p11 }
  0x94   : > { %1569 = shalt.err (!%p1566_p12)
}
  0x95   : > { %1363 = dma.hbm_to_vmem [thread:$0]  (!%p1993_p9), %s2000_s8, 256, %s1987_s19, %s323_s7  }
  0x96   : > { %p2265_p2 = scmp.ne.s32.totalorder %s2254_s17, 0 }
  0x97   : > { %s2030_s14 = sand.u32 (!%p2265_p2), 1, %s1712_s28   ;;  %p2266_p13 = scmp.ne.s32.totalorder (!%p2265_p2), %s2251_s15, 0 }
  0x98   : > { %345 = sbr.rel (%p2265_p2) target bundleno = 775 (0x307), region = 44  ;;  %s2033_s6 = sshll.u32 (!%p2265_p2), %s2030_s14, 4 }
  0x99   : > { %s348_s25 = scalar_lea.sflag (!%p2265_p2), [#allocation3], %s2030_s14  ;;  %s351_s24 = scalar_lea.vmem (!%p2265_p2), [#allocation2], %s2033_s6 }
  0x9f   : > { %1687 = dma.done.wait (%p2266_p13), %s348_s25, 256  }
  0xa0   : > { %1689 = vsyncadd (%p2266_p13), %s348_s25, 4294967040  ;;  %p2267_p9 = scmp.eq.s32.totalorder %s1836_s13, 0 }
  0xa2   : > { %1691 = dma.done.wait (%p2267_p9), [#allocation6], 16384   ;;  %p2268_p6 = pmov %p2267_p9 }
  0xa4   : > { %1693 = vsyncadd (%p2268_p6), [#allocation6], 4294950912  ;;  %p2269_p0 = pmov %p2268_p6 }
  0xa6   : > { %1695 = dma.done.wait (%p2269_p0), [#allocation9], 8192   ;;  %p2270_p10 = pmov %p2269_p0 }
  0xa7   : > { %v2049_v0 = vld [vmem:[%s351_s24] sm:$0xff]  ;;  %v2051_v1 = vld [vmem:[%s351_s24 + $0x8] sm:$0xff]  ;;  %s2271_s8 = sld [smem:[#allocation20_spill]]  ;;  %s1130_s7 = sshll.u32 %s1724_s9, 2 }
  0xa8   : > { %1697 = vsyncadd (%p2270_p10), [#allocation9], 4294959104  ;;  %v410_v2 = vadd.f32 %v2051_v1, %v2049_v0  ;;  %v454_v3 = vld [vmem:[#allocation5 + $0x8] sm:$0xff]  ;;  %v456_v4 = vld [vmem:[#allocation5 + $0x18] sm:$0xff]  ;;  %s398_s5 = scalar_lea.vmem [#allocation11], %s2033_s6  ;;  %s871_s3 = sand.u32 1, %s1836_s13  }
  0xa9   : > { %v453_v5 = vld [vmem:[#allocation5] sm:$0xff]  ;;  %v1138_v6 = vpack.c.bf16 %v456_v4, %v454_v3  ;;  %v455_v7 = vld [vmem:[#allocation5 + $0x10] sm:$0xff]  ;;  %v591_v8 = vld [vmem:[#allocation7 + $0x8] sm:$0xff]  ;;  %s908_s20 = sshll.u32 %s398_s5, 4  ;;  %s2083_s16 = scalar_lea.vmem [#allocation10], %s2033_s6  ;;  %s2088_s20 = int_to_ptr.vmem [resolvable:$true] %s908_s20 }
  0xaa   : > { %411 = vadd.xlane.f32.xlu0 %v410_v2  ;;  %v593_v9 = vld [vmem:[#allocation7 + $0x18] sm:$0xff]  ;;  %v1140_v10 = vpack.c.bf16 %v455_v7, %v453_v5  ;;  %v590_v12 = vld [vmem:[#allocation7] sm:$0xff]  ;;  %v592_v13 = vld [vmem:[#allocation7 + $0x10] sm:$0xff]  ;;  %s891_s18 = sshll.u32 %s2083_s16, 4  ;;  %s2272_s25 = sld [smem:[#allocation27_spill]]  ;;  %s2096_s18 = int_to_ptr.vmem [resolvable:$true] %s891_s18 }
  0xab   : > { %v1202_v11 = vpack.c.bf16 %v593_v9, %v591_v8  ;;  %v458_v14 = vld [vmem:[#allocation5 + $0x28] sm:$0xff]  ;;  %1139 = vmatprep.subr.bf16.mxu0 %v1138_v6  ;;  %v1204_v15 = vpack.c.bf16 %v592_v13, %v590_v12  ;;  %v460_v16 = vld [vmem:[#allocation5 + $0x38] sm:$0xff]  ;;  %v457_v17 = vld [vmem:[#allocation5 + $0x20] sm:$0xff]  ;;  %s2273_s15 = sld [smem:[#allocation26_spill]]  ;;  %s2105_s19 = scalar_lea.sflag [#allocation12], %s871_s3 }
  0xac   : > { %v459_v18 = vld [vmem:[#allocation5 + $0x30] sm:$0xff]  ;;  %1141 = vmatpush1.bf16.msra.mxu0 %v1140_v10  ;;  %v1142_v19 = vpack.c.bf16 %v460_v16, %v458_v14  ;;  %v595_v21 = vld [vmem:[#allocation7 + $0x28] sm:$0xff]  ;;  %v597_v22 = vld [vmem:[#allocation7 + $0x38] sm:$0xff] }
  0xad   : > { %1203 = vmatprep.subr.bf16.mxu1 %v1202_v11  ;;  %v1144_v20 = vpack.c.bf16 %v459_v18, %v457_v17  ;;  %v594_v23 = vld [vmem:[#allocation7 + $0x20] sm:$0xff]  ;;  %v1206_v24 = vpack.c.bf16 %v597_v22, %v595_v21  ;;  %v596_v25 = vld [vmem:[#allocation7 + $0x30] sm:$0xff]  ;;  %v462_v26 = vld [vmem:[#allocation5 + $0x48] sm:$0xff]  ;;  %s888_s26 = sadd.s32 %s2271_s8, %s1130_s7  ;;  %s1570_s8 = scalar_lea.vmem %s2088_s20, 256 }
  0xae   : > { %1205 = vmatpush1.bf16.msra.mxu1 %v1204_v15  ;;  %v464_v27 = vld [vmem:[#allocation5 + $0x58] sm:$0xff]  ;;  %1143 = vmatprep.subr.bf16.mxu0 %v1142_v19  ;;  %v1208_v28 = vpack.c.bf16 %v596_v25, %v594_v23  ;;  %v461_v30 = vld [vmem:[#allocation5 + $0x40] sm:$0xff]  ;;  %v463_v31 = vld [vmem:[#allocation5 + $0x50] sm:$0xff]  ;;  %s2086_s21 = sshll.u32 %s888_s26, 7  ;;  %p1571_p5 = scmp.ne.s32.totalorder %s2088_s20, %s1570_s8 }
  0xaf   : > { %v1146_v29 = vpack.c.bf16 %v464_v27, %v462_v26  ;;  %v599_v32 = vld [vmem:[#allocation7 + $0x48] sm:$0xff]  ;;  %1207 = vmatprep.subr.bf16.mxu1 %v1206_v24  ;;  %v601_v33 = vld [vmem:[#allocation7 + $0x58] sm:$0xff]  ;;  %v598_v34 = vld [vmem:[#allocation7 + $0x40] sm:$0xff]  ;;  %v1148_v36 = vpack.c.bf16 %v463_v31, %v461_v30  ;;  %s1744_s7 = smov [#allocation11]  }
  0xb0   : > { %v600_v35 = vld [vmem:[#allocation7 + $0x50] sm:$0xff]  ;;  %1145 = vmatpush1.bf16.msra.mxu0 %v1144_v20  ;;  %v1210_v37 = vpack.c.bf16 %v601_v33, %v599_v32  ;;  %v466_v38 = vld [vmem:[#allocation5 + $0x68] sm:$0xff]  ;;  %v468_v39 = vld [vmem:[#allocation5 + $0x78] sm:$0xff]  ;;  %s2094_s13 = scalar_lea.hbm %s2272_s25, %s2086_s21  ;;  %p1572_p7 = pnand %p1571_p5, %p1968_p3 }
  0xb1   : > { %v465_v40 = vld [vmem:[#allocation5 + $0x60] sm:$0xff]  ;;  %1147 = vmatprep.subr.bf16.mxu0 %v1146_v29  ;;  %v1212_v41 = vpack.c.bf16 %v600_v35, %v598_v34  ;;  %v1150_v42 = vpack.c.bf16 %v468_v39, %v466_v38  ;;  %v467_v43 = vld [vmem:[#allocation5 + $0x70] sm:$0xff]  ;;  %v603_v44 = vld [vmem:[#allocation7 + $0x68] sm:$0xff]  ;;  %s2102_s17 = scalar_lea.hbm %s2273_s15, %s2086_s21  ;;  %s1574_s26 = sshll.u32 %s1744_s7, 4  ;;  %s1575_s26 = int_to_ptr.vmem [resolvable:$false] %s1574_s26 }
  0xb2   : > { %1209 = vmatpush1.bf16.msra.mxu1 %v1208_v28  ;;  %v605_v45 = vld [vmem:[#allocation7 + $0x78] sm:$0xff]  ;;  %v602_v47 = vld [vmem:[#allocation7 + $0x60] sm:$0xff]  ;;  %v604_v48 = vld [vmem:[#allocation7 + $0x70] sm:$0xff]  ;;  %v1152_v51 = vpack.c.bf16 %v467_v43, %v465_v40  ;;  %p1573_p11 = pneg %p1572_p7  ;;  %s1576_s9 = scalar_lea.vmem %s1575_s26, 512 }
  0xb3   : > { %1211 = vmatprep.subr.bf16.mxu1 %v1210_v37  ;;  %v1214_v46 = vpack.c.bf16 %v605_v45, %v603_v44  ;;  %v470_v49 = vld [vmem:[#allocation5 + $0x88] sm:$0xff]  ;;  %v472_v50 = vld [vmem:[#allocation5 + $0x98] sm:$0xff]  ;;  %v1216_v54 = vpack.c.bf16 %v604_v48, %v602_v47  ;;  %v469_v56 = vld [vmem:[#allocation5 + $0x80] sm:$0xff]  ;;  %p1577_p1 = scmp.lt.s32.totalorder %s2088_s20, %s1575_s26  ;;  %p1578_p4 = scmp.lt.s32.totalorder %s1576_s9, %s1570_s8 }
  0xb4   : > { %1149 = vmatpush1.bf16.msra.mxu0 %v1148_v36  ;;  %v607_v52 = vld [vmem:[#allocation7 + $0x88] sm:$0xff]  ;;  %v609_v53 = vld [vmem:[#allocation7 + $0x98] sm:$0xff]  ;;  %v1154_v55 = vpack.c.bf16 %v472_v50, %v470_v49  ;;  %v471_v57 = vld [vmem:[#allocation5 + $0x90] sm:$0xff] }
  0xb5   : > { %1151 = vmatprep.subr.bf16.mxu0 %v1150_v42  ;;  %v606_v58 = vld [vmem:[#allocation7 + $0x80] sm:$0xff]  ;;  %v1218_v59 = vpack.c.bf16 %v609_v53, %v607_v52  ;;  %v608_v60 = vld [vmem:[#allocation7 + $0x90] sm:$0xff]  ;;  %v474_v61 = vld [vmem:[#allocation5 + $0xa8] sm:$0xff]  ;;  %v1156_v3 = vpack.c.bf16 %v471_v57, %v469_v56  ;;  %p1579_p8 = por %p1578_p4, %p1577_p1 }
  0xb6   : > { %1213 = vmatpush1.bf16.msra.mxu1 %v1212_v41  ;;  %v476_v62 = vld [vmem:[#allocation5 + $0xb8] sm:$0xff]  ;;  %v611_v63 = vld [vmem:[#allocation7 + $0xa8] sm:$0xff]  ;;  %v1220_v4 = vpack.c.bf16 %v608_v60, %v606_v58  ;;  %v473_v6 = vld [vmem:[#allocation5 + $0xa0] sm:$0xff] }
  0xb7   : > { %1215 = vmatprep.subr.bf16.mxu1 %v1214_v46  ;;  %v613_v2 = vld [vmem:[#allocation7 + $0xb8] sm:$0xff]  ;;  %v1158_v5 = vpack.c.bf16 %v476_v62, %v474_v61  ;;  %v475_v7 = vld [vmem:[#allocation5 + $0xb0] sm:$0xff]  ;;  %v610_v8 = vld [vmem:[#allocation7 + $0xa0] sm:$0xff]  ;;  %p1580_p12 = pnand %p1579_p8, %p1573_p11 }
  0xb8   : > { %1153 = vmatpush1.bf16.msra.mxu0 %v1152_v51  ;;  %v1222_v9 = vpack.c.bf16 %v613_v2, %v611_v63  ;;  %v612_v10 = vld [vmem:[#allocation7 + $0xb0] sm:$0xff]  ;;  %v478_v11 = vld [vmem:[#allocation5 + $0xc8] sm:$0xff]  ;;  %v480_v12 = vld [vmem:[#allocation5 + $0xd8] sm:$0xff]  ;;  %v1160_v15 = vpack.c.bf16 %v475_v7, %v473_v6 }
  0xb9   : > { %1155 = vmatprep.subr.bf16.mxu0 %v1154_v55  ;;  %v615_v13 = vld [vmem:[#allocation7 + $0xc8] sm:$0xff]  ;;  %v617_v14 = vld [vmem:[#allocation7 + $0xd8] sm:$0xff]  ;;  %v1224_v16 = vpack.c.bf16 %v612_v10, %v610_v8  ;;  %v1162_v17 = vpack.c.bf16 %v480_v12, %v478_v11  ;;  %v477_v18 = vld [vmem:[#allocation5 + $0xc0] sm:$0xff] }
  0xba   : > { %1217 = vmatpush1.bf16.msra.mxu1 %v1216_v54  ;;  %v479_v19 = vld [vmem:[#allocation5 + $0xd0] sm:$0xff]  ;;  %v614_v20 = vld [vmem:[#allocation7 + $0xc0] sm:$0xff]  ;;  %v1226_v21 = vpack.c.bf16 %v617_v14, %v615_v13  ;;  %v482_v23 = vld [vmem:[#allocation5 + $0xe8] sm:$0xff] }
  0xbb   : > { %1219 = vmatprep.subr.bf16.mxu1 %v1218_v59  ;;  %v616_v22 = vld [vmem:[#allocation7 + $0xd0] sm:$0xff]  ;;  %v484_v24 = vld [vmem:[#allocation5 + $0xf8] sm:$0xff]  ;;  %v619_v25 = vld [vmem:[#allocation7 + $0xe8] sm:$0xff]  ;;  %v1164_v27 = vpack.c.bf16 %v479_v19, %v477_v18 }
  0xbc   : > { %1157 = vmatpush1.bf16.msra.mxu0 %v1156_v3  ;;  %v621_v26 = vld [vmem:[#allocation7 + $0xf8] sm:$0xff]  ;;  %v1228_v28 = vpack.c.bf16 %v616_v22, %v614_v20  ;;  %v1166_v29 = vpack.c.bf16 %v484_v24, %v482_v23  ;;  %v481_v30 = vld [vmem:[#allocation5 + $0xe0] sm:$0xff]  ;;  %v483_v31 = vld [vmem:[#allocation5 + $0xf0] sm:$0xff] }
  0xbd   : > { %1159 = vmatprep.subr.bf16.mxu0 %v1158_v5  ;;  %v618_v32 = vld [vmem:[#allocation7 + $0xe0] sm:$0xff]  ;;  %v1230_v33 = vpack.c.bf16 %v621_v26, %v619_v25  ;;  %v620_v34 = vld [vmem:[#allocation7 + $0xf0] sm:$0xff]  ;;  %v486_v35 = vld [vmem:[#allocation5 + $0x108] sm:$0xff]  ;;  %v1168_v39 = vpack.c.bf16 %v483_v31, %v481_v30 }
  0xbe   : > { %1221 = vmatpush1.bf16.msra.mxu1 %v1220_v4  ;;  %v488_v36 = vld [vmem:[#allocation5 + $0x118] sm:$0xff]  ;;  %v623_v37 = vld [vmem:[#allocation7 + $0x108] sm:$0xff]  ;;  %v1232_v40 = vpack.c.bf16 %v620_v34, %v618_v32  ;;  %v485_v42 = vld [vmem:[#allocation5 + $0x100] sm:$0xff] }
  0xbf   : > { %1223 = vmatprep.subr.bf16.mxu1 %v1222_v9  ;;  %v625_v38 = vld [vmem:[#allocation7 + $0x118] sm:$0xff]  ;;  %v1170_v41 = vpack.c.bf16 %v488_v36, %v486_v35  ;;  %v487_v43 = vld [vmem:[#allocation5 + $0x110] sm:$0xff]  ;;  %v622_v44 = vld [vmem:[#allocation7 + $0x100] sm:$0xff] }
  0xc0   : > { %1161 = vmatpush1.bf16.msra.mxu0 %v1160_v15  ;;  %v1234_v45 = vpack.c.bf16 %v625_v38, %v623_v37  ;;  %v624_v46 = vld [vmem:[#allocation7 + $0x110] sm:$0xff]  ;;  %v490_v47 = vld [vmem:[#allocation5 + $0x128] sm:$0xff]  ;;  %v492_v48 = vld [vmem:[#allocation5 + $0x138] sm:$0xff]  ;;  %v1172_v51 = vpack.c.bf16 %v487_v43, %v485_v42 }
  0xc1   : > { %1163 = vmatprep.subr.bf16.mxu0 %v1162_v17  ;;  %v627_v49 = vld [vmem:[#allocation7 + $0x128] sm:$0xff]  ;;  %v629_v50 = vld [vmem:[#allocation7 + $0x138] sm:$0xff]  ;;  %v1236_v52 = vpack.c.bf16 %v624_v46, %v622_v44  ;;  %v1174_v53 = vpack.c.bf16 %v492_v48, %v490_v47  ;;  %v489_v54 = vld [vmem:[#allocation5 + $0x120] sm:$0xff] }
  0xc2   : > { %1225 = vmatpush1.bf16.msra.mxu1 %v1224_v16  ;;  %v491_v55 = vld [vmem:[#allocation5 + $0x130] sm:$0xff]  ;;  %v626_v56 = vld [vmem:[#allocation7 + $0x120] sm:$0xff]  ;;  %v1238_v57 = vpack.c.bf16 %v629_v50, %v627_v49  ;;  %v494_v59 = vld [vmem:[#allocation5 + $0x148] sm:$0xff] }
  0xc3   : > { %1227 = vmatprep.subr.bf16.mxu1 %v1226_v21  ;;  %v628_v58 = vld [vmem:[#allocation7 + $0x130] sm:$0xff]  ;;  %v496_v60 = vld [vmem:[#allocation5 + $0x158] sm:$0xff]  ;;  %v631_v61 = vld [vmem:[#allocation7 + $0x148] sm:$0xff]  ;;  %v1176_v63 = vpack.c.bf16 %v491_v55, %v489_v54 }
  0xc4   : > { %1165 = vmatpush1.bf16.msra.mxu0 %v1164_v27  ;;  %v633_v62 = vld [vmem:[#allocation7 + $0x158] sm:$0xff]  ;;  %v1240_v2 = vpack.c.bf16 %v628_v58, %v626_v56  ;;  %v1178_v3 = vpack.c.bf16 %v496_v60, %v494_v59  ;;  %v493_v4 = vld [vmem:[#allocation5 + $0x140] sm:$0xff]  ;;  %v495_v5 = vld [vmem:[#allocation5 + $0x150] sm:$0xff] }
  0xc5   : > { %1167 = vmatprep.subr.bf16.mxu0 %v1166_v29  ;;  %v1242_v6 = vpack.c.bf16 %v633_v62, %v631_v61  ;;  %v630_v7 = vld [vmem:[#allocation7 + $0x140] sm:$0xff]  ;;  %v632_v8 = vld [vmem:[#allocation7 + $0x150] sm:$0xff]  ;;  %v1180_v9 = vpack.c.bf16 %v495_v5, %v493_v4  ;;  %v498_v18 = vld [vmem:[#allocation5 + $0x168] sm:$0xff] }
  0xc6   : > { %1229 = vmatpush1.bf16.msra.mxu1 %v1228_v28  ;;  %v1244_v10 = vpack.c.bf16 %v632_v8, %v630_v7  ;;  %v500_v19 = vld [vmem:[#allocation5 + $0x178] sm:$0xff]  ;;  %v497_v21 = vld [vmem:[#allocation5 + $0x160] sm:$0xff]  ;;  %v499_v22 = vld [vmem:[#allocation5 + $0x170] sm:$0xff] }
  0xc7   : > { %1231 = vmatprep.subr.bf16.mxu1 %v1230_v33  ;;  %v1182_v20 = vpack.c.bf16 %v500_v19, %v498_v18  ;;  %v635_v23 = vld [vmem:[#allocation7 + $0x168] sm:$0xff]  ;;  %v1184_v24 = vpack.c.bf16 %v499_v22, %v497_v21  ;;  %v634_v25 = vld [vmem:[#allocation7 + $0x160] sm:$0xff]  ;;  %v636_v26 = vld [vmem:[#allocation7 + $0x170] sm:$0xff]  ;;  %v428_v21 = vlaneseq }
  0xc8   : > { %1169 = vmatpush1.bf16.msra.mxu0 %v1168_v39  ;;  %v1248_v27 = vpack.c.bf16 %v636_v26, %v634_v25  ;;  %v502_v28 = vld [vmem:[#allocation5 + $0x188] sm:$0xff]  ;;  %v504_v29 = vld [vmem:[#allocation5 + $0x198] sm:$0xff]  ;;  %v501_v31 = vld [vmem:[#allocation5 + $0x180] sm:$0xff] }
  0xc9   : > { %1171 = vmatprep.subr.bf16.mxu0 %v1170_v41  ;;  %v1186_v30 = vpack.c.bf16 %v504_v29, %v502_v28  ;;  %v503_v32 = vld [vmem:[#allocation5 + $0x190] sm:$0xff]  ;;  %v639_v33 = vld [vmem:[#allocation7 + $0x188] sm:$0xff]  ;;  %v641_v35 = vld [vmem:[#allocation7 + $0x198] sm:$0xff] }
  0xca   : > { %1233 = vmatpush1.bf16.msra.mxu1 %v1232_v40  ;;  %v1188_v34 = vpack.c.bf16 %v503_v32, %v501_v31  ;;  %v638_v36 = vld [vmem:[#allocation7 + $0x180] sm:$0xff]  ;;  %v640_v37 = vld [vmem:[#allocation7 + $0x190] sm:$0xff]  ;;  %v1250_v38 = vpack.c.bf16 %v641_v35, %v639_v33  ;;  %v506_v40 = vld [vmem:[#allocation5 + $0x1a8] sm:$0xff] }
  0xcb   : > { %1235 = vmatprep.subr.bf16.mxu1 %v1234_v45  ;;  %v1252_v39 = vpack.c.bf16 %v640_v37, %v638_v36  ;;  %v508_v41 = vld [vmem:[#allocation5 + $0x1b8] sm:$0xff]  ;;  %v505_v42 = vld [vmem:[#allocation5 + $0x1a0] sm:$0xff]  ;;  %v507_v44 = vld [vmem:[#allocation5 + $0x1b0] sm:$0xff] }
  0xcc   : > { %1173 = vmatpush1.bf16.msra.mxu0 %v1172_v51  ;;  %v1190_v43 = vpack.c.bf16 %v508_v41, %v506_v40  ;;  %v643_v45 = vld [vmem:[#allocation7 + $0x1a8] sm:$0xff]  ;;  %v645_v46 = vld [vmem:[#allocation7 + $0x1b8] sm:$0xff]  ;;  %v1192_v47 = vpack.c.bf16 %v507_v44, %v505_v42  ;;  %v642_v49 = vld [vmem:[#allocation7 + $0x1a0] sm:$0xff] }
  0xcd   : > { %1175 = vmatprep.subr.bf16.mxu0 %v1174_v53  ;;  %v1254_v48 = vpack.c.bf16 %v645_v46, %v643_v45  ;;  %v644_v50 = vld [vmem:[#allocation7 + $0x1b0] sm:$0xff]  ;;  %v510_v51 = vld [vmem:[#allocation5 + $0x1c8] sm:$0xff]  ;;  %v512_v53 = vld [vmem:[#allocation5 + $0x1d8] sm:$0xff] }
  0xce   : > { %1237 = vmatpush1.bf16.msra.mxu1 %v1236_v52  ;;  %v1256_v52 = vpack.c.bf16 %v644_v50, %v642_v49  ;;  %v509_v54 = vld [vmem:[#allocation5 + $0x1c0] sm:$0xff]  ;;  %v511_v55 = vld [vmem:[#allocation5 + $0x1d0] sm:$0xff]  ;;  %v1194_v56 = vpack.c.bf16 %v512_v53, %v510_v51  ;;  %v649_v58 = vld [vmem:[#allocation7 + $0x1d8] sm:$0xff] }
  0xcf   : > { %1239 = vmatprep.subr.bf16.mxu1 %v1238_v57  ;;  %v647_v57 = vld [vmem:[#allocation7 + $0x1c8] sm:$0xff]  ;;  %v646_v59 = vld [vmem:[#allocation7 + $0x1c0] sm:$0xff]  ;;  %v1196_v60 = vpack.c.bf16 %v511_v55, %v509_v54  ;;  %v648_v62 = vld [vmem:[#allocation7 + $0x1d0] sm:$0xff] }
  0xd0   : > { %1177 = vmatpush1.bf16.msra.mxu0 %v1176_v63  ;;  %v1258_v61 = vpack.c.bf16 %v649_v58, %v647_v57  ;;  %v514_v63 = vld [vmem:[#allocation5 + $0x1e8] sm:$0xff]  ;;  %v513_v4 = vld [vmem:[#allocation5 + $0x1e0] sm:$0xff]  ;;  %v515_v5 = vld [vmem:[#allocation5 + $0x1f0] sm:$0xff]  ;;  %v1260_v7 = vpack.c.bf16 %v648_v62, %v646_v59 }
  0xd1   : > { %1179 = vmatprep.subr.bf16.mxu0 %v1178_v3  ;;  %v653_v8 = vld [vmem:[#allocation7 + $0x1f8] sm:$0xff]  ;;  %v408_v25 = vld [vmem:[%s2225_s1] sm:$0x3]  ;;  %v730_v37 = vld [vmem:[#allocation8 + $0x28] sm:$0xff] }
  0xd2   : > { %1241 = vmatpush1.bf16.msra.mxu1 %v1240_v2  ;;  %v516_v2 = vld [vmem:[#allocation5 + $0x1f8] sm:$0xff]  ;;  %v409_v26 = vld [vmem:[%s2226_s2] sm:$0x3]  ;;  %v731_v44 = vld [vmem:[#allocation8 + $0x30] sm:$0xff] }
  0xd3   : > { %1243 = vmatprep.subr.bf16.mxu1 %v1242_v6  ;;  %v1198_v3 = vpack.c.bf16 %v516_v2, %v514_v63  ;;  %v651_v6 = vld [vmem:[#allocation7 + $0x1e8] sm:$0xff]  ;;  %v725_v33 = vld [vmem:[#allocation8] sm:$0xff]  ;;  %v736_v45 = vld [vmem:[#allocation8 + $0x58] sm:$0xff] }
  0xd4   : > { %1181 = vmatpush1.bf16.msra.mxu0 %v1180_v9  ;;  %v1262_v9 = vpack.c.bf16 %v653_v8, %v651_v6  ;;  %v738_v49 = vld [vmem:[#allocation8 + $0x68] sm:$0xff]  ;;  %v740_v50 = vld [vmem:[#allocation8 + $0x78] sm:$0xff]  ;;  %v737_v53 = vld [vmem:[#allocation8 + $0x60] sm:$0xff] }
  0xd5   : > { %1183 = vmatprep.subr.bf16.mxu0 %v1182_v20  ;;  %v739_v54 = vld [vmem:[#allocation8 + $0x70] sm:$0xff]  ;;  %v742_v55 = vld [vmem:[#allocation8 + $0x88] sm:$0xff]  ;;  %v741_v59 = vld [vmem:[#allocation8 + $0x80] sm:$0xff] }
  0xd6   : > { %1245 = vmatpush1.bf16.msra.mxu1 %v1244_v10  ;;  %v650_v10 = vld [vmem:[#allocation7 + $0x1e0] sm:$0xff]  ;;  %v1280_v57 = vpack.c.bf16 %v739_v54, %v737_v53  ;;  %v748_v62 = vld [vmem:[#allocation8 + $0xb8] sm:$0xff] }
  0xd7   : > { %v752_v6 = vld [vmem:[#allocation8 + $0xd8] sm:$0xff] }
  0xd8   : > { %1185 = vmatpush1.bf16.msra.mxu0 %v1184_v24  ;;  %v784_v53 = vld [vmem:[#allocation8 + $0x1d8] sm:$0xff] }
  0xd9   : > { %1187 = vmatprep.subr.bf16.mxu0 %v1186_v30 }
  0xdc   : > { %1189 = vmatpush1.bf16.msra.mxu0 %v1188_v34  ;;  %v727_v34 = vld [vmem:[#allocation8 + $0x10] sm:$0xff] }
  0xdd   : > { %1191 = vmatprep.subr.bf16.mxu0 %v1190_v43  ;;  %v1268_v41 = vpack.c.bf16 %v727_v34, %v725_v33  ;;  %v729_v43 = vld [vmem:[#allocation8 + $0x20] sm:$0xff]  ;;  %v767_v34 = vld [vmem:[#allocation8 + $0x150] sm:$0xff] }
  0xde   : > { %v765_v33 = vld [vmem:[#allocation8 + $0x140] sm:$0xff] }
  0xe0   : > { %1193 = vmatpush1.bf16.msra.mxu0 %v1192_v47  ;;  %v733_v47 = vld [vmem:[#allocation8 + $0x40] sm:$0xff] }
  0xe1   : > { %1195 = vmatprep.subr.bf16.mxu0 %v1194_v56  ;;  %v744_v56 = vld [vmem:[#allocation8 + $0x98] sm:$0xff] }
  0xe2   : > { %v1282_v58 = vpack.c.bf16 %v744_v56, %v742_v55  ;;  %v781_v56 = vld [vmem:[#allocation8 + $0x1c0] sm:$0xff] }
  0xe4   : > { %1197 = vmatpush1.bf16.msra.mxu0 %v1196_v60  ;;  %v743_v60 = vld [vmem:[#allocation8 + $0x90] sm:$0xff] }
  0xe5   : > { %1199 = vmatprep.subr.bf16.mxu0 %v1198_v3  ;;  %v1284_v63 = vpack.c.bf16 %v743_v60, %v741_v59  ;;  %v745_v3 = vld [vmem:[#allocation8 + $0xa0] sm:$0xff]  ;;  %v788_v59 = vld [vmem:[#allocation8 + $0x1f8] sm:$0xff] }
 0x137   : > { %v412_v11 = vpop.xlane.xlu0 %411 }
 0x138   : > { %v414_v12 = vmul.f32 0.00390625, %v412_v11  ;;  %v652_v11 = vld [vmem:[#allocation7 + $0x1f0] sm:$0xff] }
 0x13a   : > { %v2056_v13 = vsub.f32 %v2049_v0, %v414_v12  ;;  %v2059_v14 = vsub.f32 %v2051_v1, %v414_v12  ;;  %v637_v0 = vld [vmem:[#allocation7 + $0x178] sm:$0xff]  ;;  %v1200_v12 = vpack.c.bf16 %v515_v5, %v513_v4  ;;  %v747_v4 = vld [vmem:[#allocation8 + $0xb0] sm:$0xff]  ;;  %v750_v5 = vld [vmem:[#allocation8 + $0xc8] sm:$0xff] }
 0x13b   : > { %v1246_v1 = vpack.c.bf16 %v637_v0, %v635_v23  ;;  %v429_v23 = vshrl.u32 %v428_v21, 7  ;;  %v1290_v8 = vpack.c.bf16 %v752_v6, %v750_v5 }
 0x13c   : > { %v417_v15 = vmul.f32 %v2056_v13, %v2056_v13  ;;  %v418_v16 = vmul.f32 %v2059_v14, %v2059_v14  ;;  %1201 = vmatpush1.bf16.msra.mxu0 %v1200_v12  ;;  %v756_v12 = vld [vmem:[#allocation8 + $0xf8] sm:$0xff] }
 0x13d   : > { %1247 = vmatprep.subr.bf16.mxu1 %v1246_v1  ;;  %v434_v24 = vsub.s32 1, %v429_v23  ;;  %v430_v0 = vsub.s32 0, %v429_v23  ;;  %v757_v23 = vld [vmem:[#allocation8 + $0x100] sm:$0xff] }
 0x13e   : > { %v419_v17 = vadd.f32 %v418_v16, %v417_v15  ;;  %1249 = vmatpush1.bf16.msra.mxu1 %v1248_v27  ;;  %v1264_v15 = vpack.c.bf16 %v652_v11, %v650_v10  ;;  %v726_v16 = vld [vmem:[#allocation8 + $0x8] sm:$0xff]  ;;  %v751_v10 = vld [vmem:[#allocation8 + $0xd0] sm:$0xff] }
 0x13f   : > { %1251 = vmatprep.subr.bf16.mxu1 %v1250_v38  ;;  %v435_v1 = vrot.slane %v408_v25, %v434_v24  ;;  %v431_v27 = vrot.slane %v408_v25, %v430_v0  ;;  %v448_v30 = vrot.slane %v409_v26, %v434_v24  ;;  %v444_v32 = vrot.slane %v409_v26, %v430_v0  ;;  %v732_v38 = vld [vmem:[#allocation8 + $0x38] sm:$0xff]  ;;  %v754_v11 = vld [vmem:[#allocation8 + $0xe8] sm:$0xff]  ;;  %v759_v24 = vld [vmem:[#allocation8 + $0x110] sm:$0xff] }
 0x140   : > { %420 = vadd.xlane.f32.xlu0 %v419_v17  ;;  %v728_v17 = vld [vmem:[#allocation8 + $0x18] sm:$0xff]  ;;  %v1270_v42 = vpack.c.bf16 %v732_v38, %v730_v37  ;;  %v762_v0 = vld [vmem:[#allocation8 + $0x128] sm:$0xff]  ;;  %v1300_v26 = vpack.c.bf16 %v759_v24, %v757_v23  ;;  %v1308_v37 = vpack.c.bf16 %v767_v34, %v765_v33 }
 0x141   : > { %v1266_v18 = vpack.c.bf16 %v728_v17, %v726_v16  ;;  %v1294_v16 = vpack.c.bf16 %v756_v12, %v754_v11  ;;  %v753_v17 = vld [vmem:[#allocation8 + $0xe0] sm:$0xff]  ;;  %v764_v25 = vld [vmem:[#allocation8 + $0x138] sm:$0xff] }
 0x142   : > { %1253 = vmatpush1.bf16.msra.mxu1 %v1252_v39 }
 0x143   : > { %1255 = vmatprep.subr.bf16.mxu1 %v1254_v48  ;;  %1267 = vmatprep.subr.bf16.mxu0 %v1266_v18  ;;  %v735_v48 = vld [vmem:[#allocation8 + $0x50] sm:$0xff] }
 0x144   : > { %v1276_v51 = vpack.c.bf16 %v735_v48, %v733_v47  ;;  %v755_v18 = vld [vmem:[#allocation8 + $0xf0] sm:$0xff]  ;;  %v780_v47 = vld [vmem:[#allocation8 + $0x1b8] sm:$0xff] }
 0x145   : > { %v1296_v21 = vpack.c.bf16 %v755_v18, %v753_v17 }
 0x146   : > { %1257 = vmatpush1.bf16.msra.mxu1 %v1256_v52  ;;  %v1278_v52 = vpack.c.bf16 %v740_v50, %v738_v49  ;;  %v777_v50 = vld [vmem:[#allocation8 + $0x1a0] sm:$0xff] }
 0x147   : > { %1259 = vmatprep.subr.bf16.mxu1 %v1258_v61  ;;  %v746_v61 = vld [vmem:[#allocation8 + $0xa8] sm:$0xff] }
 0x148   : > { %v1286_v2 = vpack.c.bf16 %v748_v62, %v746_v61  ;;  %v785_v62 = vld [vmem:[#allocation8 + $0x1e0] sm:$0xff] }
 0x14a   : > { %1261 = vmatpush1.bf16.msra.mxu1 %v1260_v7  ;;  %v1288_v7 = vpack.c.bf16 %v747_v4, %v745_v3 }
 0x14b   : > { %1263 = vmatprep.subr.bf16.mxu1 %v1262_v9  ;;  %v749_v9 = vld [vmem:[#allocation8 + $0xc0] sm:$0xff] }
 0x14e   : > { %1265 = vmatpush1.bf16.msra.mxu1 %v1264_v15  ;;  %v1292_v15 = vpack.c.bf16 %v751_v10, %v749_v9 }
 0x1cd   : > { %v421_v19 = vpop.xlane.xlu0 %420 }
 0x1ce   : > { %v422_v20 = vmul.f32 0.00390625, %v421_v19  ;;  %v758_v19 = vld [vmem:[#allocation8 + $0x108] sm:$0xff] }
 0x1d0   : > { %v423_v22 = vadd.f32 1e-05, %v422_v20  ;;  %v760_v20 = vld [vmem:[#allocation8 + $0x118] sm:$0xff] }
 0x1d2   : > { %1454 = vrsqrt.f32 %v423_v22  ;;  %v1298_v22 = vpack.c.bf16 %v760_v20, %v758_v19 }
 0x1dc   : > { %v1455_v28 = vpop.eup %1454 }
 0x1dd   : > { %v426_v29 = vmul.f32 %v1455_v28, %v2059_v14  ;;  %v425_v31 = vmul.f32 %v1455_v28, %v2056_v13  ;;  %v734_v14 = vld [vmem:[#allocation8 + $0x48] sm:$0xff]  ;;  %v1272_v13 = vpack.c.bf16 %v731_v44, %v729_v43  ;;  %v763_v28 = vld [vmem:[#allocation8 + $0x130] sm:$0xff]  ;;  %v776_v43 = vld [vmem:[#allocation8 + $0x198] sm:$0xff] }
 0x1de   : > { %v1274_v46 = vpack.c.bf16 %v736_v45, %v734_v14  ;;  %v773_v45 = vld [vmem:[#allocation8 + $0x180] sm:$0xff] }
 0x1df   : > { %v439_v35 = vmul.f32 %v435_v1, %v426_v29  ;;  %v438_v36 = vmul.f32 %v431_v27, %v425_v31  ;;  %v1302_v1 = vpack.c.bf16 %v764_v25, %v762_v0  ;;  %v761_v27 = vld [vmem:[#allocation8 + $0x120] sm:$0xff]  ;;  %v766_v29 = vld [vmem:[#allocation8 + $0x148] sm:$0xff] }
 0x1e0   : > { %v1304_v31 = vpack.c.bf16 %v763_v28, %v761_v27 }
 0x1e1   : > { %v452_v39 = vadd.f32 %v448_v30, %v439_v35  ;;  %v2073_v40 = vadd.f32 %v444_v32, %v438_v36  ;;  %v768_v30 = vld [vmem:[#allocation8 + $0x158] sm:$0xff]  ;;  %v770_v35 = vld [vmem:[#allocation8 + $0x168] sm:$0xff] }
 0x1e2   : > { %v1306_v32 = vpack.c.bf16 %v768_v30, %v766_v29  ;;  %v772_v36 = vld [vmem:[#allocation8 + $0x178] sm:$0xff] }
 0x1e3   : > { %581 = vmatprep.mubr.f32.mxu0 %v452_v39  ;;  %718 = vmatprep.mubr.f32.mxu1 %v452_v39  ;;  %v1310_v38 = vpack.c.bf16 %v772_v36, %v770_v35 }
 0x1e4   : > { %582 = vmatmul.mubr.f32.vlgmr.msra.gmra.mrb[0].mxu0 %v2073_v40  ;;  %719 = vmatmul.mubr.f32.vlgmr.msra.gmra.mrb[0].mxu1 %v2073_v40 }
 0x1e5   : > { %1269 = vmatpush1.bf16.msra.mxu0 %v1268_v41  ;;  %853 = vmatprep.mubr.f32.mxu0 %v452_v39  ;;  %v769_v39 = vld [vmem:[#allocation8 + $0x160] sm:$0xff]  ;;  %v771_v41 = vld [vmem:[#allocation8 + $0x170] sm:$0xff] }
 0x1e6   : > { %1271 = vmatprep.subr.bf16.mxu0 %v1270_v42  ;;  %v774_v42 = vld [vmem:[#allocation8 + $0x188] sm:$0xff]  ;;  %v1312_v44 = vpack.c.bf16 %v771_v41, %v769_v39 }
 0x1e7   : > { %v1314_v14 = vpack.c.bf16 %v776_v43, %v774_v42 }
 0x1e9   : > { %1273 = vmatpush1.bf16.msra.mxu0 %v1272_v13  ;;  %v775_v13 = vld [vmem:[#allocation8 + $0x190] sm:$0xff] }
 0x1ea   : > { %1275 = vmatprep.subr.bf16.mxu0 %v1274_v46  ;;  %v778_v46 = vld [vmem:[#allocation8 + $0x1a8] sm:$0xff]  ;;  %v1316_v48 = vpack.c.bf16 %v775_v13, %v773_v45 }
 0x1eb   : > { %v1318_v49 = vpack.c.bf16 %v780_v47, %v778_v46 }
 0x1ed   : > { %1277 = vmatpush1.bf16.msra.mxu0 %v1276_v51  ;;  %v779_v51 = vld [vmem:[#allocation8 + $0x1b0] sm:$0xff] }
 0x1ee   : > { %1279 = vmatprep.subr.bf16.mxu0 %v1278_v52  ;;  %v782_v52 = vld [vmem:[#allocation8 + $0x1c8] sm:$0xff]  ;;  %v1320_v54 = vpack.c.bf16 %v779_v51, %v777_v50 }
 0x1ef   : > { %v1322_v55 = vpack.c.bf16 %v784_v53, %v782_v52 }
 0x1f1   : > { %1281 = vmatpush1.bf16.msra.mxu0 %v1280_v57  ;;  %v783_v57 = vld [vmem:[#allocation8 + $0x1d0] sm:$0xff] }
 0x1f2   : > { %1283 = vmatprep.subr.bf16.mxu0 %v1282_v58  ;;  %v786_v58 = vld [vmem:[#allocation8 + $0x1e8] sm:$0xff]  ;;  %v1324_v60 = vpack.c.bf16 %v783_v57, %v781_v56 }
 0x1f3   : > { %v1326_v61 = vpack.c.bf16 %v788_v59, %v786_v58 }
 0x1f5   : > { %1285 = vmatpush1.bf16.msra.mxu0 %v1284_v63  ;;  %v787_v63 = vld [vmem:[#allocation8 + $0x1f0] sm:$0xff] }
 0x1f6   : > { %1287 = vmatprep.subr.bf16.mxu0 %v1286_v2  ;;  %v1328_v2 = vpack.c.bf16 %v787_v63, %v785_v62 }
 0x1f9   : > { %1289 = vmatpush1.bf16.msra.mxu0 %v1288_v7 }
 0x1fa   : > { %1291 = vmatprep.subr.bf16.mxu0 %v1290_v8 }
 0x1fd   : > { %1293 = vmatpush1.bf16.msra.mxu0 %v1292_v15 }
 0x1fe   : > { %1295 = vmatprep.subr.bf16.mxu0 %v1294_v16 }
 0x201   : > { %1297 = vmatpush1.bf16.msra.mxu0 %v1296_v21 }
 0x202   : > { %1299 = vmatprep.subr.bf16.mxu0 %v1298_v22 }
 0x205   : > { %1301 = vmatpush1.bf16.msra.mxu0 %v1300_v26 }
 0x206   : > { %1303 = vmatprep.subr.bf16.mxu0 %v1302_v1 }
 0x209   : > { %1305 = vmatpush1.bf16.msra.mxu0 %v1304_v31 }
 0x20a   : > { %1307 = vmatprep.subr.bf16.mxu0 %v1306_v32 }
 0x20d   : > { %1309 = vmatpush1.bf16.msra.mxu0 %v1308_v37 }
 0x20e   : > { %1311 = vmatprep.subr.bf16.mxu0 %v1310_v38 }
 0x211   : > { %1313 = vmatpush1.bf16.msra.mxu0 %v1312_v44 }
 0x212   : > { %1315 = vmatprep.subr.bf16.mxu0 %v1314_v14 }
 0x215   : > { %1317 = vmatpush1.bf16.msra.mxu0 %v1316_v48 }
 0x216   : > { %1319 = vmatprep.subr.bf16.mxu0 %v1318_v49 }
 0x219   : > { %1321 = vmatpush1.bf16.msra.mxu0 %v1320_v54 }
 0x21a   : > { %1323 = vmatprep.subr.bf16.mxu0 %v1322_v55 }
 0x21d   : > { %1325 = vmatpush1.bf16.msra.mxu0 %v1324_v60 }
 0x21e   : > { %1327 = vmatprep.subr.bf16.mxu0 %v1326_v61 }
 0x221   : > { %1329 = vmatpush1.bf16.msra.mxu0 %v1328_v2 }
 0x224   : > { %854 = vmatmul.mubr.f32.vlgmr.msra.gmra.mrb[2].mxu0 %v2073_v40 }
 0x2b7   : > { %v583_v40 = vpop.f32.mrb[0].mxu0  ;;  %v720_v3 = vpop.f32.mrb[0].mxu1 }
 0x2b8   : > { %v588_v4 = vmul.f32 0.088388346, %v583_v40  ;;  %862 = vst [vmem:[%s398_s5] sm:$0xff] %v720_v3  ;;  %v585_v5 = vpop.f32.mrb[1].mxu0  ;;  %v722_v6 = vpop.f32.mrb[1].mxu1 }
 0x2b9   : > { %v589_v7 = vmul.f32 0.088388346, %v585_v5  ;;  %863 = vst [vmem:[%s398_s5 + $0x8] sm:$0xff] %v722_v6 }
 0x2ba   : > { %860 = vst [vmem:[%s2083_s16] sm:$0xff] %v588_v4 }
 0x2bb   : > { %1583 = shalt.err (!%p1580_p12)
}
 0x2bc   : > { %s1584_s5 = scalar_lea.hbm %s2094_s13, 256  ;;  %s1588_s24 = scalar_lea.hbm %s2272_s25, 1024 }
 0x2bd   : > { %p1585_p2 = scmp.ne.s32.totalorder %s2094_s13, %s1584_s5  ;;  %p1589_p6 = scmp.lt.u32.totalorder %s2094_s13, %s2272_s25 }
 0x2be   : > { %p1590_p0 = scmp.lt.u32.totalorder %s1588_s24, %s1584_s5  ;;  %p1592_p5 = scmp.lt.u32.totalorder %s1584_s5, %s2094_s13 }
 0x2bf   : > { %p1586_p13 = pnand %p1585_p2, %p1968_p3 }
 0x2c0   : > { %p1591_p10 = por %p1590_p0, %p1589_p6 }
 0x2c1   : > { %p1587_p9 = pneg %p1586_p13 }
 0x2c2   : > { %p1593_p7 = por %p1592_p5, %p1591_p10 }
 0x2c4   : > { %p1594_p11 = pnand %p1593_p7, %p1587_p9 }
 0x2c6   : > { %1597 = shalt.err (!%p1594_p11)
}
 0x2c7   : > { %s1745_s8 = smov 128   ;;  %s1746_s26 = smov 256   ;;  %861 = vst [vmem:[%s2083_s16 + $0x8] sm:$0xff] %v589_v7 }
 0x2c8   : > { %s1747_s9 = smov 8   ;;  %s867_s5 = scalar_lea.sflag [#allocation4], %s2030_s14 }
 0x2c9   : > { %1345 = dma.vmem_to_hbm [thread:$0]  (%p1968_p3), %s2088_s20, 256, %s2094_s13, %s2105_s19, %s1745_s8, %s1746_s26, %s1747_s9  }
 0x2ca   : > { %s1598_s3 = scalar_lea.vmem %s2096_s18, 256  ;;  %s1748_s23 = smov [#allocation10]  }
 0x2cb   : > { %p1599_p1 = scmp.ne.s32.totalorder %s2096_s18, %s1598_s3  ;;  %s1602_s24 = sshll.u32 %s1748_s23, 4  ;;  %s1603_s24 = int_to_ptr.vmem [resolvable:$false] %s1602_s24 }
 0x2cc   : > { %s1604_s4 = scalar_lea.vmem %s1603_s24, 512  ;;  %p1605_p12 = scmp.lt.s32.totalorder %s2096_s18, %s1603_s24 }
 0x2cd   : > { %p1600_p4 = pnand %p1599_p1, %p1968_p3  ;;  %p1606_p2 = scmp.lt.s32.totalorder %s1604_s4, %s1598_s3 }
 0x2cf   : > { %p1601_p8 = pneg %p1600_p4  ;;  %p1607_p13 = por %p1606_p2, %p1605_p12 }
 0x2d1   : > { %p1608_p9 = pnand %p1607_p13, %p1601_p8 }
 0x2d3   : > { %1611 = shalt.err (!%p1608_p9)
}
 0x2d4   : > { %s1612_s20 = scalar_lea.hbm %s2102_s17, 256  ;;  %s1616_s7 = scalar_lea.hbm %s2273_s15, 1024 }
 0x2d5   : > { %p1613_p6 = scmp.ne.s32.totalorder %s2102_s17, %s1612_s20  ;;  %p1617_p5 = scmp.lt.u32.totalorder %s2102_s17, %s2273_s15 }
 0x2d6   : > { %p1618_p7 = scmp.lt.u32.totalorder %s1616_s7, %s1612_s20  ;;  %p1620_p1 = scmp.lt.u32.totalorder %s1612_s20, %s2102_s17 }
 0x2d7   : > { %p1614_p0 = pnand %p1613_p6, %p1968_p3 }
 0x2d8   : > { %p1619_p11 = por %p1618_p7, %p1617_p5 }
 0x2d9   : > { %p1615_p10 = pneg %p1614_p0 }
 0x2da   : > { %p1621_p4 = por %p1620_p1, %p1619_p11 }
 0x2dc   : > { %p1622_p8 = pnand %p1621_p4, %p1615_p10 }
 0x2de   : > { %1625 = shalt.err (!%p1622_p8)
}
 0x2df   : > { %1344 = dma.vmem_to_hbm [thread:$0]  (%p1968_p3), %s2096_s18, 256, %s2102_s17, %s867_s5, %s1745_s8, %s1746_s26, %s1747_s9  }
 0x2e0   : > { %s405_s3 = scalar_lea.vmem [#allocation13], %s2033_s6  ;;  %s2274_s13 = sld [smem:[#allocation28_spill]] }
 0x2e1   : > { %s925_s4 = sshll.u32 %s405_s3, 4  ;;  %s1749_s6 = smov [#allocation13]   ;;  %s2161_s4 = int_to_ptr.vmem [resolvable:$true] %s925_s4 }
 0x2e2   : > { %s1626_s14 = scalar_lea.vmem %s2161_s4, 256  ;;  %s1630_s18 = sshll.u32 %s1749_s6, 4  ;;  %s1631_s18 = int_to_ptr.vmem [resolvable:$false] %s1630_s18 }
 0x2e3   : > { %p1627_p12 = scmp.ne.s32.totalorder %s2161_s4, %s1626_s14  ;;  %s1632_s17 = scalar_lea.vmem %s1631_s18, 512 }
 0x2e4   : > { %p1633_p9 = scmp.lt.s32.totalorder %s2161_s4, %s1631_s18  ;;  %p1634_p6 = scmp.lt.s32.totalorder %s1632_s17, %s1626_s14 }
 0x2e5   : > { %p1628_p2 = pnand %p1627_p12, %p1968_p3 }
 0x2e6   : > { %s2167_s7 = scalar_lea.hbm %s2274_s13, %s2086_s21  ;;  %p1635_p0 = por %p1634_p6, %p1633_p9 }
 0x2e7   : > { %p1629_p13 = pneg %p1628_p2 }
 0x2e9   : > { %p1636_p10 = pnand %p1635_p0, %p1629_p13 }
 0x2f7   : > { %v855_v8 = vpop.f32.mrb[2].mxu0 }
 0x2f8   : > { %864 = vst [vmem:[%s405_s3] sm:$0xff] %v855_v8  ;;  %v857_v9 = vpop.f32.mrb[3].mxu0 }
 0x2f9   : > { %865 = vst [vmem:[%s405_s3 + $0x8] sm:$0xff] %v857_v9 }
 0x2fa   : > { %1639 = shalt.err (!%p1636_p10)
}
 0x2fb   : > { %s1640_s21 = scalar_lea.hbm %s2167_s7, 256  ;;  %s1644_s24 = scalar_lea.hbm %s2274_s13, 1024 }
 0x2fc   : > { %p1641_p5 = scmp.ne.s32.totalorder %s2167_s7, %s1640_s21  ;;  %p1645_p1 = scmp.lt.u32.totalorder %s2167_s7, %s2274_s13 }
 0x2fd   : > { %p1646_p4 = scmp.lt.u32.totalorder %s1644_s24, %s1640_s21  ;;  %p1648_p12 = scmp.lt.u32.totalorder %s1640_s21, %s2167_s7 }
 0x2fe   : > { %p1642_p7 = pnand %p1641_p5, %p1968_p3 }
 0x2ff   : > { %p1647_p8 = por %p1646_p4, %p1645_p1 }
 0x300   : > { %p1643_p11 = pneg %p1642_p7 }
 0x301   : > { %p1649_p2 = por %p1648_p12, %p1647_p8 }
 0x303   : > { %p1650_p13 = pnand %p1649_p2, %p1643_p11 }
 0x305   : > { %1653 = shalt.err (!%p1650_p13)
}
 0x306   : > { %1346 = dma.vmem_to_hbm [thread:$0]  (%p1968_p3), %s2161_s4, 256, %s2167_s7, %s2105_s19, %s1745_s8, %s1746_s26, %s1747_s9  }
 0x307 PF: > { %s2275_s16 = sld [smem:[#allocation19_spill]]  ;;  %s2276_s14 = sld [smem:[#allocation21_spill]] }
 0x308   : > { %p1381_p9 = scmp.ge.s32.totalorder %s1736_s12, 2 }
 0x30d   : > { %s940_s6 = sand.u32 1, %s2275_s16   ;;  %p2277_p6 = scmp.ne.s32.totalorder %s2276_s14, 0 }
 0x30e   : > { %s941_s18 = scalar_lea.sflag [#allocation4], %s940_s6 }
 0x30f   : > { %p1365_p0 = pnand %p1381_p9, %p2277_p6 }
 0x311   : > { %1699 = dma.done.wait (!%p1365_p0), %s941_s18, 256  }
 0x312   : > { %1701 = vsyncadd (!%p1365_p0), %s941_s18, 4294967040  ;;  %s2278_s30 = sadd.s32 4294967294, %s1736_s12  }
 0x313   : > { %s949_s17 = sand.u32 1, %s2278_s30  }
 0x314   : > { %s950_s21 = scalar_lea.sflag [#allocation12], %s949_s17 }
 0x315   : > { %1703 = dma.done.wait (!%p1365_p0), %s950_s21, 512  }
 0x316   : > { %1705 = vsyncadd (!%p1365_p0), %s950_s21, 4294966784  ;;  %s30_s12 = sadd.s32 1, %s1736_s12   ;;  %s2279_s19 = smov %s2289_s27 }
 0x317   : > { %p27_p3 = scmp.ge.s32.totalorder %s30_s12, 6   ;;  %s2280_s8 = sld [smem:[#allocation22_spill]] }
 0x318   : > { %s2281_s27 = smov %s1712_s28  ;;  %s2282_s28 = smov %s1716_s29 }
 0x319   : > { %s2283_s29 = smov %s1985_s22  ;;  %s2284_s30 = smov %s1728_s10 }
 0x31a   : > { %s2285_s9 = smov %s1732_s11  ;;  %s2286_s10 = smov %s2279_s19 }
 0x31b   :  { %29 = sbr.rel (!%p27_p3) target bundleno = 18 (0x12), region = 133 }
 0x31d   : > { %s2287_s11 = smov %s2280_s8 }
 0x322   :  { %964 = vsyncpa [#allocation3], 1 }
 0x323   :  { %966 = vsyncpa [#allocation3 + $0x1], 1 }
 0x324   :  { %967 = vsyncpa [#allocation6], 1 }
 0x325   :  { %968 = vsyncpa [#allocation9], 1 }
 0x326   :  { %969 = vsyncpa [#allocation4], 1 }
 0x327   :  { %971 = vsyncpa [#allocation4 + $0x1], 1 }
 0x328   :  { %972 = vsyncpa [#allocation12], 1 }
 0x329   :  { %974 = vsyncpa [#allocation12 + $0x1], 1 }

</bundles_post_ra>
